<compile_context>
chip_gen: v7x
topology: tpu7x:2x2x1
jax: 0.10.0
libtpu: 0.0.40
codegen_flags: <defaults>
</compile_context>

<pallas_src>
import functools

import jax
import jax.numpy as jnp
from jax import lax
from jax.experimental import pallas as pl
from jax.experimental.pallas import tpu as pltpu


# ---------------------------------------------------------------------------
# Fused Pallas kernel: GRU + 1x1-conv head + temporal mean + sigmoid
# ---------------------------------------------------------------------------
def gru_mean_fc_kernel(e_ref, wih_ref, bih_ref, whh_ref, bhh_ref,
                       wfc_ref, bfc_ref, o_ref, xp_ref, *, L, BP, H):
    """e_ref:   (L*BP, E)   time-major embedded input, batch padded to BP
       wih_ref: (E, 3H)     weight_ih_l0^T   (gate order r, z, n)
       bih_ref: (1, 3H)     bias_ih_l0
       whh_ref: (H, 3H)     weight_hh_l0^T
       bhh_ref: (1, 3H)     bias_hh_l0
       wfc_ref: (H, 1)      Conv1d(H, 1, 1) weight
       bfc_ref: (1, 1)      Conv1d bias
       o_ref:   (BP, 1)     sigmoid(mean_t(fc(h_t)))
       xp_ref:  (L*BP, 3H)  VMEM scratch: all input projections
    """
    # One big MXU matmul for every time step's input projection (M = L*BP).
    xp_ref[...] = (
        jnp.dot(e_ref[...], wih_ref[...], preferred_element_type=jnp.float32)
        + bih_ref[...])

    whh = whh_ref[...]          # hoisted out of the time loop
    bhh = bhh_ref[...]

    def step(t, carry):
        h_prev, h_sum = carry
        row = pl.multiple_of(t * BP, BP)              # aligned sublane window
        gx = xp_ref[pl.ds(row, BP), :]                # (BP, 3H)
        gh = jnp.dot(h_prev, whh, preferred_element_type=jnp.float32) + bhh
        r = jax.nn.sigmoid(gx[:, 0:H] + gh[:, 0:H])
        z = jax.nn.sigmoid(gx[:, H:2 * H] + gh[:, H:2 * H])
        n = jnp.tanh(gx[:, 2 * H:3 * H] + r * gh[:, 2 * H:3 * H])
        h_new = (1.0 - z) * n + z * h_prev
        return h_new, h_sum + h_new

    h0 = jnp.zeros((BP, H), jnp.float32)
    _, h_sum = lax.fori_loop(0, L, step, (h0, h0), unroll=True)

    # 1x1 Conv1d is linear -> mean over time commutes with it.
    h_mean = h_sum * (1.0 / L)
    logits = (jnp.dot(h_mean, wfc_ref[...], preferred_element_type=jnp.float32)
              + bfc_ref[...])
    o_ref[...] = jax.nn.sigmoid(logits)


# ---------------------------------------------------------------------------
# Wrapper
# ---------------------------------------------------------------------------
def _full_spec(shape):
    # Single-program grid: block == full array.
    n = len(shape)
    return pl.BlockSpec(shape, lambda i, _n=n: (0,) * _n)


def lstm_tr_forward(params, x):
    """Mirrors LSTM_TR.forward: returns sigmoid scores, shape (B,)."""
    E = params["embed"][x].astype(jnp.float32)           # (B, L, emb) gather
    B, L, emb = E.shape
    H = params["whh_t"].shape[0]
    BP = ((B + 7) // 8) * 8                               # pad batch to a sublane tile

    e_tb = jnp.transpose(E, (1, 0, 2))                    # time-major (L, B, emb)
    e_tb = jnp.pad(e_tb, ((0, 0), (0, BP - B), (0, 0)))
    e_flat = e_tb.reshape(L * BP, emb)

    out = pl.pallas_call(
        functools.partial(gru_mean_fc_kernel, L=L, BP=BP, H=H),
        out_shape=jax.ShapeDtypeStruct((BP, 1), jnp.float32),
        grid=(1,),
        in_specs=[_full_spec((L * BP, emb)),
                  _full_spec(params["wih_t"].shape),
                  _full_spec(params["b_ih"].shape),
                  _full_spec(params["whh_t"].shape),
                  _full_spec(params["b_hh"].shape),
                  _full_spec(params["wfc"].shape),
                  _full_spec(params["b_fc"].shape)],
        out_specs=_full_spec((BP, 1)),
        scratch_shapes=[pltpu.VMEM((L * BP, 3 * H), jnp.float32)],
    )(e_flat, params["wih_t"], params["b_ih"], params["whh_t"], params["b_hh"],
      params["wfc"], params["b_fc"])
    return out[:B, 0]                                     # == .mean(2).squeeze(), sigmoid'ed


# ---------------------------------------------------------------------------
# Pure-JAX reference (same math, PyTorch GRU equations, fc-then-mean order)
# ---------------------------------------------------------------------------
def _reference_forward(params, x):
    E = params["embed"][x].astype(jnp.float32)            # (B, L, emb)
    B, _, _ = E.shape
    H = params["whh_t"].shape[0]
    wih_t, whh_t = params["wih_t"], params["whh_t"]
    b_ih, b_hh = params["b_ih"][0], params["b_hh"][0]

    def step(h, e_t):
        gx = e_t @ wih_t + b_ih
        gh = h @ whh_t + b_hh
        r = jax.nn.sigmoid(gx[:, :H] + gh[:, :H])
        z = jax.nn.sigmoid(gx[:, H:2 * H] + gh[:, H:2 * H])
        n = jnp.tanh(gx[:, 2 * H:] + r * gh[:, 2 * H:])
        h_new = (1.0 - z) * n + z * h
        return h_new, h_new

    h0 = jnp.zeros((B, H), jnp.float32)
    _, hs = lax.scan(step, h0, jnp.transpose(E, (1, 0, 2)))   # (L, B, H)
    y_t = jnp.einsum("lbh,hc->lbc", hs, params["wfc"]) + params["b_fc"]  # (L, B, 1)
    return jax.nn.sigmoid(jnp.mean(y_t, axis=0))[:, 0]


# ---------------------------------------------------------------------------
# Main
# ---------------------------------------------------------------------------
if __name__ == "__main__":
    # Module-consistent small config: h = 128 and C = 1 are hardcoded in LSTM_TR.
    B, L, VOCAB, EMB, H, C = 2, 16, 50, 32, 128, 1

    key = jax.random.PRNGKey(0)
    ks = iter(jax.random.split(key, 16))

    params = {
        "embed": jax.random.normal(next(ks), (VOCAB, EMB), jnp.float32) * 0.1,
        # GRU params stored transposed for the kernel: (in, 3H) / (H, 3H).
        "wih_t": jax.random.normal(next(ks), (EMB, 3 * H), jnp.float32) * 0.1,
        "b_ih": jax.random.normal(next(ks), (1, 3 * H), jnp.float32) * 0.05,
        "whh_t": jax.random.normal(next(ks), (H, 3 * H), jnp.float32) * 0.1,
        "b_hh": jax.random.normal(next(ks), (1, 3 * H), jnp.float32) * 0.05,
        # Conv1d(H, 1, kernel_size=1) == per-time-step linear (H -> 1).
        "wfc": jax.random.normal(next(ks), (H, C), jnp.float32) * 0.1,
        "b_fc": jax.random.normal(next(ks), (1, C), jnp.float32) * 0.01,
    }

    x = jax.random.randint(next(ks), (B, L), 0, VOCAB, jnp.int32)

    y = lstm_tr_forward(params, x)
    y = jax.block_until_ready(y)

    y_ref = _reference_forward(params, x)
    assert y.shape == (B,), y.shape
    assert jnp.max(jnp.abs(y - y_ref)) < 1e-3, "Pallas output mismatch vs JAX reference"

    print("KERNEL_OK")
</pallas_src>

<mosaic_0001>
module attributes {stable_mosaic.version = 11 : i64} {
  func.func @gru_mean_fc_kernel(%arg0: i32, %arg1: memref<128x32xf32, #tpu.memory_space<vmem>>, %arg2: memref<32x384xf32, #tpu.memory_space<vmem>>, %arg3: memref<1x384xf32, #tpu.memory_space<vmem>>, %arg4: memref<128x384xf32, #tpu.memory_space<vmem>>, %arg5: memref<1x384xf32, #tpu.memory_space<vmem>>, %arg6: memref<128x1xf32, #tpu.memory_space<vmem>>, %arg7: memref<1x1xf32, #tpu.memory_space<vmem>>, %arg8: memref<8x1xf32, #tpu.memory_space<vmem>>, %arg9: memref<128x384xf32, #tpu.memory_space<vmem>>) attributes {dimension_semantics = [#tpu.dimension_semantics<arbitrary>], iteration_bounds = array<i64: 1>, scalar_prefetch = 0 : i64, scratch_operands = 1 : i64, tpu.core_type = #tpu.core_type<tc>, window_params = [{pipeline_mode = #tpu.pipeline_mode<synchronous>, transform_indices = @transform_0, window_bounds = array<i64: 128, 32>}, {pipeline_mode = #tpu.pipeline_mode<synchronous>, transform_indices = @transform_1, window_bounds = array<i64: 32, 384>}, {pipeline_mode = #tpu.pipeline_mode<synchronous>, transform_indices = @transform_2, window_bounds = array<i64: 1, 384>}, {pipeline_mode = #tpu.pipeline_mode<synchronous>, transform_indices = @transform_3, window_bounds = array<i64: 128, 384>}, {pipeline_mode = #tpu.pipeline_mode<synchronous>, transform_indices = @transform_4, window_bounds = array<i64: 1, 384>}, {pipeline_mode = #tpu.pipeline_mode<synchronous>, transform_indices = @transform_5, window_bounds = array<i64: 128, 1>}, {pipeline_mode = #tpu.pipeline_mode<synchronous>, transform_indices = @transform_6, window_bounds = array<i64: 1, 1>}, {pipeline_mode = #tpu.pipeline_mode<synchronous>, transform_indices = @transform_7, window_bounds = array<i64: 8, 1>}]} {
    %c0 = arith.constant 0 : index
    %c0_0 = arith.constant 0 : index
    %0 = vector.load %arg1[%c0, %c0_0] : memref<128x32xf32, #tpu.memory_space<vmem>>, vector<128x32xf32>
    %c0_1 = arith.constant 0 : index
    %c0_2 = arith.constant 0 : index
    %1 = vector.load %arg2[%c0_1, %c0_2] : memref<32x384xf32, #tpu.memory_space<vmem>>, vector<32x384xf32>
    %cst = arith.constant dense<0.000000e+00> : vector<128x384xf32>
    %2 = tpu.matmul %0, %1, %cst {dimension_numbers = #tpu.dot_dimension_numbers<[1], [0], [0], [1], [0, 0, 1, 1], [], []>} : vector<128x32xf32>, vector<32x384xf32>, vector<128x384xf32> -> vector<128x384xf32>
    %c0_3 = arith.constant 0 : index
    %c0_4 = arith.constant 0 : index
    %3 = vector.load %arg3[%c0_3, %c0_4] : memref<1x384xf32, #tpu.memory_space<vmem>>, vector<1x384xf32>
    %4 = vector.broadcast %3 : vector<1x384xf32> to vector<128x384xf32>
    %5 = arith.addf %2, %4 : vector<128x384xf32>
    %c0_5 = arith.constant 0 : index
    %c0_6 = arith.constant 0 : index
    %6 = vector.load %arg9[%c0_5, %c0_6] : memref<128x384xf32, #tpu.memory_space<vmem>>, vector<128x384xf32>
    tpu.vector_store %arg9[%c0_5, %c0_6], %5 {strides = array<i32>} : memref<128x384xf32, #tpu.memory_space<vmem>>, vector<128x384xf32>,
    %c0_7 = arith.constant 0 : index
    %c0_8 = arith.constant 0 : index
    %7 = vector.load %arg4[%c0_7, %c0_8] : memref<128x384xf32, #tpu.memory_space<vmem>>, vector<128x384xf32>
    %c0_9 = arith.constant 0 : index
    %c0_10 = arith.constant 0 : index
    %8 = vector.load %arg5[%c0_9, %c0_10] : memref<1x384xf32, #tpu.memory_space<vmem>>, vector<1x384xf32>
    %cst_11 = arith.constant 0.000000e+00 : f32
    %9 = vector.broadcast %cst_11 : f32 to vector<8x128xf32>
    %c0_i32 = arith.constant 0 : i32
    %c8_i32 = arith.constant 8 : i32
    %10 = arith.muli %c0_i32, %c8_i32 : i32
    %11 = tpu.assume_multiple %10, 8 : i32
    %12 = arith.index_cast %11 : i32 to index
    %c0_12 = arith.constant 0 : index
    %13 = vector.load %arg9[%12, %c0_12] : memref<128x384xf32, #tpu.memory_space<vmem>>, vector<8x384xf32>
    %cst_13 = arith.constant dense<0.000000e+00> : vector<8x384xf32>
    %14 = tpu.matmul %9, %7, %cst_13 {dimension_numbers = #tpu.dot_dimension_numbers<[1], [0], [0], [1], [0, 0, 1, 1], [], []>} : vector<8x128xf32>, vector<128x384xf32>, vector<8x384xf32> -> vector<8x384xf32>
    %15 = vector.broadcast %8 : vector<1x384xf32> to vector<8x384xf32>
    %16 = arith.addf %14, %15 : vector<8x384xf32>
    %17 = vector.extract_strided_slice %13 {offsets = [0, 0], sizes = [8, 128], strides = [1, 1]} : vector<8x384xf32> to vector<8x128xf32>
    %18 = vector.extract_strided_slice %16 {offsets = [0, 0], sizes = [8, 128], strides = [1, 1]} : vector<8x384xf32> to vector<8x128xf32>
    %19 = arith.addf %17, %18 : vector<8x128xf32>
    %20 = arith.negf %19 : vector<8x128xf32>
    %21 = math.exp %20 : vector<8x128xf32>
    %cst_14 = arith.constant 1.000000e+00 : f32
    %22 = vector.broadcast %cst_14 : f32 to vector<8x128xf32>
    %23 = arith.addf %22, %21 : vector<8x128xf32>
    %24 = arith.divf %22, %23 : vector<8x128xf32>
    %25 = vector.extract_strided_slice %13 {offsets = [0, 128], sizes = [8, 128], strides = [1, 1]} : vector<8x384xf32> to vector<8x128xf32>
    %26 = vector.extract_strided_slice %16 {offsets = [0, 128], sizes = [8, 128], strides = [1, 1]} : vector<8x384xf32> to vector<8x128xf32>
    %27 = arith.addf %25, %26 : vector<8x128xf32>
    %28 = arith.negf %27 : vector<8x128xf32>
    %29 = math.exp %28 : vector<8x128xf32>
    %cst_15 = arith.constant 1.000000e+00 : f32
    %30 = vector.broadcast %cst_15 : f32 to vector<8x128xf32>
    %31 = arith.addf %30, %29 : vector<8x128xf32>
    %32 = arith.divf %30, %31 : vector<8x128xf32>
    %33 = vector.extract_strided_slice %13 {offsets = [0, 256], sizes = [8, 128], strides = [1, 1]} : vector<8x384xf32> to vector<8x128xf32>
    %34 = vector.extract_strided_slice %16 {offsets = [0, 256], sizes = [8, 128], strides = [1, 1]} : vector<8x384xf32> to vector<8x128xf32>
    %35 = arith.mulf %24, %34 : vector<8x128xf32>
    %36 = arith.addf %33, %35 : vector<8x128xf32>
    %37 = math.tanh %36 : vector<8x128xf32>
    %cst_16 = arith.constant 1.000000e+00 : f32
    %38 = vector.broadcast %cst_16 : f32 to vector<8x128xf32>
    %39 = arith.subf %38, %32 : vector<8x128xf32>
    %40 = arith.mulf %39, %37 : vector<8x128xf32>
    %41 = arith.mulf %32, %9 : vector<8x128xf32>
    %42 = arith.addf %40, %41 : vector<8x128xf32>
    %43 = arith.addf %9, %42 : vector<8x128xf32>
    %c1_i32 = arith.constant 1 : i32
    %c8_i32_17 = arith.constant 8 : i32
    %44 = arith.muli %c1_i32, %c8_i32_17 : i32
    %45 = tpu.assume_multiple %44, 8 : i32
    %46 = arith.index_cast %45 : i32 to index
    %c0_18 = arith.constant 0 : index
    %47 = vector.load %arg9[%46, %c0_18] : memref<128x384xf32, #tpu.memory_space<vmem>>, vector<8x384xf32>
    %cst_19 = arith.constant dense<0.000000e+00> : vector<8x384xf32>
    %48 = tpu.matmul %42, %7, %cst_19 {dimension_numbers = #tpu.dot_dimension_numbers<[1], [0], [0], [1], [0, 0, 1, 1], [], []>} : vector<8x128xf32>, vector<128x384xf32>, vector<8x384xf32> -> vector<8x384xf32>
    %49 = vector.broadcast %8 : vector<1x384xf32> to vector<8x384xf32>
    %50 = arith.addf %48, %49 : vector<8x384xf32>
    %51 = vector.extract_strided_slice %47 {offsets = [0, 0], sizes = [8, 128], strides = [1, 1]} : vector<8x384xf32> to vector<8x128xf32>
    %52 = vector.extract_strided_slice %50 {offsets = [0, 0], sizes = [8, 128], strides = [1, 1]} : vector<8x384xf32> to vector<8x128xf32>
    %53 = arith.addf %51, %52 : vector<8x128xf32>
    %54 = arith.negf %53 : vector<8x128xf32>
    %55 = math.exp %54 : vector<8x128xf32>
    %cst_20 = arith.constant 1.000000e+00 : f32
    %56 = vector.broadcast %cst_20 : f32 to vector<8x128xf32>
    %57 = arith.addf %56, %55 : vector<8x128xf32>
    %58 = arith.divf %56, %57 : vector<8x128xf32>
    %59 = vector.extract_strided_slice %47 {offsets = [0, 128], sizes = [8, 128], strides = [1, 1]} : vector<8x384xf32> to vector<8x128xf32>
    %60 = vector.extract_strided_slice %50 {offsets = [0, 128], sizes = [8, 128], strides = [1, 1]} : vector<8x384xf32> to vector<8x128xf32>
    %61 = arith.addf %59, %60 : vector<8x128xf32>
    %62 = arith.negf %61 : vector<8x128xf32>
    %63 = math.exp %62 : vector<8x128xf32>
    %cst_21 = arith.constant 1.000000e+00 : f32
    %64 = vector.broadcast %cst_21 : f32 to vector<8x128xf32>
    %65 = arith.addf %64, %63 : vector<8x128xf32>
    %66 = arith.divf %64, %65 : vector<8x128xf32>
    %67 = vector.extract_strided_slice %47 {offsets = [0, 256], sizes = [8, 128], strides = [1, 1]} : vector<8x384xf32> to vector<8x128xf32>
    %68 = vector.extract_strided_slice %50 {offsets = [0, 256], sizes = [8, 128], strides = [1, 1]} : vector<8x384xf32> to vector<8x128xf32>
    %69 = arith.mulf %58, %68 : vector<8x128xf32>
    %70 = arith.addf %67, %69 : vector<8x128xf32>
    %71 = math.tanh %70 : vector<8x128xf32>
    %cst_22 = arith.constant 1.000000e+00 : f32
    %72 = vector.broadcast %cst_22 : f32 to vector<8x128xf32>
    %73 = arith.subf %72, %66 : vector<8x128xf32>
    %74 = arith.mulf %73, %71 : vector<8x128xf32>
    %75 = arith.mulf %66, %42 : vector<8x128xf32>
    %76 = arith.addf %74, %75 : vector<8x128xf32>
    %77 = arith.addf %43, %76 : vector<8x128xf32>
    %c2_i32 = arith.constant 2 : i32
    %c8_i32_23 = arith.constant 8 : i32
    %78 = arith.muli %c2_i32, %c8_i32_23 : i32
    %79 = tpu.assume_multiple %78, 8 : i32
    %80 = arith.index_cast %79 : i32 to index
    %c0_24 = arith.constant 0 : index
    %81 = vector.load %arg9[%80, %c0_24] : memref<128x384xf32, #tpu.memory_space<vmem>>, vector<8x384xf32>
    %cst_25 = arith.constant dense<0.000000e+00> : vector<8x384xf32>
    %82 = tpu.matmul %76, %7, %cst_25 {dimension_numbers = #tpu.dot_dimension_numbers<[1], [0], [0], [1], [0, 0, 1, 1], [], []>} : vector<8x128xf32>, vector<128x384xf32>, vector<8x384xf32> -> vector<8x384xf32>
    %83 = vector.broadcast %8 : vector<1x384xf32> to vector<8x384xf32>
    %84 = arith.addf %82, %83 : vector<8x384xf32>
    %85 = vector.extract_strided_slice %81 {offsets = [0, 0], sizes = [8, 128], strides = [1, 1]} : vector<8x384xf32> to vector<8x128xf32>
    %86 = vector.extract_strided_slice %84 {offsets = [0, 0], sizes = [8, 128], strides = [1, 1]} : vector<8x384xf32> to vector<8x128xf32>
    %87 = arith.addf %85, %86 : vector<8x128xf32>
    %88 = arith.negf %87 : vector<8x128xf32>
    %89 = math.exp %88 : vector<8x128xf32>
    %cst_26 = arith.constant 1.000000e+00 : f32
    %90 = vector.broadcast %cst_26 : f32 to vector<8x128xf32>
    %91 = arith.addf %90, %89 : vector<8x128xf32>
    %92 = arith.divf %90, %91 : vector<8x128xf32>
    %93 = vector.extract_strided_slice %81 {offsets = [0, 128], sizes = [8, 128], strides = [1, 1]} : vector<8x384xf32> to vector<8x128xf32>
    %94 = vector.extract_strided_slice %84 {offsets = [0, 128], sizes = [8, 128], strides = [1, 1]} : vector<8x384xf32> to vector<8x128xf32>
    %95 = arith.addf %93, %94 : vector<8x128xf32>
    %96 = arith.negf %95 : vector<8x128xf32>
    %97 = math.exp %96 : vector<8x128xf32>
    %cst_27 = arith.constant 1.000000e+00 : f32
    %98 = vector.broadcast %cst_27 : f32 to vector<8x128xf32>
    %99 = arith.addf %98, %97 : vector<8x128xf32>
    %100 = arith.divf %98, %99 : vector<8x128xf32>
    %101 = vector.extract_strided_slice %81 {offsets = [0, 256], sizes = [8, 128], strides = [1, 1]} : vector<8x384xf32> to vector<8x128xf32>
    %102 = vector.extract_strided_slice %84 {offsets = [0, 256], sizes = [8, 128], strides = [1, 1]} : vector<8x384xf32> to vector<8x128xf32>
    %103 = arith.mulf %92, %102 : vector<8x128xf32>
    %104 = arith.addf %101, %103 : vector<8x128xf32>
    %105 = math.tanh %104 : vector<8x128xf32>
    %cst_28 = arith.constant 1.000000e+00 : f32
    %106 = vector.broadcast %cst_28 : f32 to vector<8x128xf32>
    %107 = arith.subf %106, %100 : vector<8x128xf32>
    %108 = arith.mulf %107, %105 : vector<8x128xf32>
    %109 = arith.mulf %100, %76 : vector<8x128xf32>
    %110 = arith.addf %108, %109 : vector<8x128xf32>
    %111 = arith.addf %77, %110 : vector<8x128xf32>
    %c3_i32 = arith.constant 3 : i32
    %c8_i32_29 = arith.constant 8 : i32
    %112 = arith.muli %c3_i32, %c8_i32_29 : i32
    %113 = tpu.assume_multiple %112, 8 : i32
    %114 = arith.index_cast %113 : i32 to index
    %c0_30 = arith.constant 0 : index
    %115 = vector.load %arg9[%114, %c0_30] : memref<128x384xf32, #tpu.memory_space<vmem>>, vector<8x384xf32>
    %cst_31 = arith.constant dense<0.000000e+00> : vector<8x384xf32>
    %116 = tpu.matmul %110, %7, %cst_31 {dimension_numbers = #tpu.dot_dimension_numbers<[1], [0], [0], [1], [0, 0, 1, 1], [], []>} : vector<8x128xf32>, vector<128x384xf32>, vector<8x384xf32> -> vector<8x384xf32>
    %117 = vector.broadcast %8 : vector<1x384xf32> to vector<8x384xf32>
    %118 = arith.addf %116, %117 : vector<8x384xf32>
    %119 = vector.extract_strided_slice %115 {offsets = [0, 0], sizes = [8, 128], strides = [1, 1]} : vector<8x384xf32> to vector<8x128xf32>
    %120 = vector.extract_strided_slice %118 {offsets = [0, 0], sizes = [8, 128], strides = [1, 1]} : vector<8x384xf32> to vector<8x128xf32>
    %121 = arith.addf %119, %120 : vector<8x128xf32>
    %122 = arith.negf %121 : vector<8x128xf32>
    %123 = math.exp %122 : vector<8x128xf32>
    %cst_32 = arith.constant 1.000000e+00 : f32
    %124 = vector.broadcast %cst_32 : f32 to vector<8x128xf32>
    %125 = arith.addf %124, %123 : vector<8x128xf32>
    %126 = arith.divf %124, %125 : vector<8x128xf32>
    %127 = vector.extract_strided_slice %115 {offsets = [0, 128], sizes = [8, 128], strides = [1, 1]} : vector<8x384xf32> to vector<8x128xf32>
    %128 = vector.extract_strided_slice %118 {offsets = [0, 128], sizes = [8, 128], strides = [1, 1]} : vector<8x384xf32> to vector<8x128xf32>
    %129 = arith.addf %127, %128 : vector<8x128xf32>
    %130 = arith.negf %129 : vector<8x128xf32>
    %131 = math.exp %130 : vector<8x128xf32>
    %cst_33 = arith.constant 1.000000e+00 : f32
    %132 = vector.broadcast %cst_33 : f32 to vector<8x128xf32>
    %133 = arith.addf %132, %131 : vector<8x128xf32>
    %134 = arith.divf %132, %133 : vector<8x128xf32>
    %135 = vector.extract_strided_slice %115 {offsets = [0, 256], sizes = [8, 128], strides = [1, 1]} : vector<8x384xf32> to vector<8x128xf32>
    %136 = vector.extract_strided_slice %118 {offsets = [0, 256], sizes = [8, 128], strides = [1, 1]} : vector<8x384xf32> to vector<8x128xf32>
    %137 = arith.mulf %126, %136 : vector<8x128xf32>
    %138 = arith.addf %135, %137 : vector<8x128xf32>
    %139 = math.tanh %138 : vector<8x128xf32>
    %cst_34 = arith.constant 1.000000e+00 : f32
    %140 = vector.broadcast %cst_34 : f32 to vector<8x128xf32>
    %141 = arith.subf %140, %134 : vector<8x128xf32>
    %142 = arith.mulf %141, %139 : vector<8x128xf32>
    %143 = arith.mulf %134, %110 : vector<8x128xf32>
    %144 = arith.addf %142, %143 : vector<8x128xf32>
    %145 = arith.addf %111, %144 : vector<8x128xf32>
    %c4_i32 = arith.constant 4 : i32
    %c8_i32_35 = arith.constant 8 : i32
    %146 = arith.muli %c4_i32, %c8_i32_35 : i32
    %147 = tpu.assume_multiple %146, 8 : i32
    %148 = arith.index_cast %147 : i32 to index
    %c0_36 = arith.constant 0 : index
    %149 = vector.load %arg9[%148, %c0_36] : memref<128x384xf32, #tpu.memory_space<vmem>>, vector<8x384xf32>
    %cst_37 = arith.constant dense<0.000000e+00> : vector<8x384xf32>
    %150 = tpu.matmul %144, %7, %cst_37 {dimension_numbers = #tpu.dot_dimension_numbers<[1], [0], [0], [1], [0, 0, 1, 1], [], []>} : vector<8x128xf32>, vector<128x384xf32>, vector<8x384xf32> -> vector<8x384xf32>
    %151 = vector.broadcast %8 : vector<1x384xf32> to vector<8x384xf32>
    %152 = arith.addf %150, %151 : vector<8x384xf32>
    %153 = vector.extract_strided_slice %149 {offsets = [0, 0], sizes = [8, 128], strides = [1, 1]} : vector<8x384xf32> to vector<8x128xf32>
    %154 = vector.extract_strided_slice %152 {offsets = [0, 0], sizes = [8, 128], strides = [1, 1]} : vector<8x384xf32> to vector<8x128xf32>
    %155 = arith.addf %153, %154 : vector<8x128xf32>
    %156 = arith.negf %155 : vector<8x128xf32>
    %157 = math.exp %156 : vector<8x128xf32>
    %cst_38 = arith.constant 1.000000e+00 : f32
    %158 = vector.broadcast %cst_38 : f32 to vector<8x128xf32>
    %159 = arith.addf %158, %157 : vector<8x128xf32>
    %160 = arith.divf %158, %159 : vector<8x128xf32>
    %161 = vector.extract_strided_slice %149 {offsets = [0, 128], sizes = [8, 128], strides = [1, 1]} : vector<8x384xf32> to vector<8x128xf32>
    %162 = vector.extract_strided_slice %152 {offsets = [0, 128], sizes = [8, 128], strides = [1, 1]} : vector<8x384xf32> to vector<8x128xf32>
    %163 = arith.addf %161, %162 : vector<8x128xf32>
    %164 = arith.negf %163 : vector<8x128xf32>
    %165 = math.exp %164 : vector<8x128xf32>
    %cst_39 = arith.constant 1.000000e+00 : f32
    %166 = vector.broadcast %cst_39 : f32 to vector<8x128xf32>
    %167 = arith.addf %166, %165 : vector<8x128xf32>
    %168 = arith.divf %166, %167 : vector<8x128xf32>
    %169 = vector.extract_strided_slice %149 {offsets = [0, 256], sizes = [8, 128], strides = [1, 1]} : vector<8x384xf32> to vector<8x128xf32>
    %170 = vector.extract_strided_slice %152 {offsets = [0, 256], sizes = [8, 128], strides = [1, 1]} : vector<8x384xf32> to vector<8x128xf32>
    %171 = arith.mulf %160, %170 : vector<8x128xf32>
    %172 = arith.addf %169, %171 : vector<8x128xf32>
    %173 = math.tanh %172 : vector<8x128xf32>
    %cst_40 = arith.constant 1.000000e+00 : f32
    %174 = vector.broadcast %cst_40 : f32 to vector<8x128xf32>
    %175 = arith.subf %174, %168 : vector<8x128xf32>
    %176 = arith.mulf %175, %173 : vector<8x128xf32>
    %177 = arith.mulf %168, %144 : vector<8x128xf32>
    %178 = arith.addf %176, %177 : vector<8x128xf32>
    %179 = arith.addf %145, %178 : vector<8x128xf32>
    %c5_i32 = arith.constant 5 : i32
    %c8_i32_41 = arith.constant 8 : i32
    %180 = arith.muli %c5_i32, %c8_i32_41 : i32
    %181 = tpu.assume_multiple %180, 8 : i32
    %182 = arith.index_cast %181 : i32 to index
    %c0_42 = arith.constant 0 : index
    %183 = vector.load %arg9[%182, %c0_42] : memref<128x384xf32, #tpu.memory_space<vmem>>, vector<8x384xf32>
    %cst_43 = arith.constant dense<0.000000e+00> : vector<8x384xf32>
    %184 = tpu.matmul %178, %7, %cst_43 {dimension_numbers = #tpu.dot_dimension_numbers<[1], [0], [0], [1], [0, 0, 1, 1], [], []>} : vector<8x128xf32>, vector<128x384xf32>, vector<8x384xf32> -> vector<8x384xf32>
    %185 = vector.broadcast %8 : vector<1x384xf32> to vector<8x384xf32>
    %186 = arith.addf %184, %185 : vector<8x384xf32>
    %187 = vector.extract_strided_slice %183 {offsets = [0, 0], sizes = [8, 128], strides = [1, 1]} : vector<8x384xf32> to vector<8x128xf32>
    %188 = vector.extract_strided_slice %186 {offsets = [0, 0], sizes = [8, 128], strides = [1, 1]} : vector<8x384xf32> to vector<8x128xf32>
    %189 = arith.addf %187, %188 : vector<8x128xf32>
    %190 = arith.negf %189 : vector<8x128xf32>
    %191 = math.exp %190 : vector<8x128xf32>
    %cst_44 = arith.constant 1.000000e+00 : f32
    %192 = vector.broadcast %cst_44 : f32 to vector<8x128xf32>
    %193 = arith.addf %192, %191 : vector<8x128xf32>
    %194 = arith.divf %192, %193 : vector<8x128xf32>
    %195 = vector.extract_strided_slice %183 {offsets = [0, 128], sizes = [8, 128], strides = [1, 1]} : vector<8x384xf32> to vector<8x128xf32>
    %196 = vector.extract_strided_slice %186 {offsets = [0, 128], sizes = [8, 128], strides = [1, 1]} : vector<8x384xf32> to vector<8x128xf32>
    %197 = arith.addf %195, %196 : vector<8x128xf32>
    %198 = arith.negf %197 : vector<8x128xf32>
    %199 = math.exp %198 : vector<8x128xf32>
    %cst_45 = arith.constant 1.000000e+00 : f32
    %200 = vector.broadcast %cst_45 : f32 to vector<8x128xf32>
    %201 = arith.addf %200, %199 : vector<8x128xf32>
    %202 = arith.divf %200, %201 : vector<8x128xf32>
    %203 = vector.extract_strided_slice %183 {offsets = [0, 256], sizes = [8, 128], strides = [1, 1]} : vector<8x384xf32> to vector<8x128xf32>
    %204 = vector.extract_strided_slice %186 {offsets = [0, 256], sizes = [8, 128], strides = [1, 1]} : vector<8x384xf32> to vector<8x128xf32>
    %205 = arith.mulf %194, %204 : vector<8x128xf32>
    %206 = arith.addf %203, %205 : vector<8x128xf32>
    %207 = math.tanh %206 : vector<8x128xf32>
    %cst_46 = arith.constant 1.000000e+00 : f32
    %208 = vector.broadcast %cst_46 : f32 to vector<8x128xf32>
    %209 = arith.subf %208, %202 : vector<8x128xf32>
    %210 = arith.mulf %209, %207 : vector<8x128xf32>
    %211 = arith.mulf %202, %178 : vector<8x128xf32>
    %212 = arith.addf %210, %211 : vector<8x128xf32>
    %213 = arith.addf %179, %212 : vector<8x128xf32>
    %c6_i32 = arith.constant 6 : i32
    %c8_i32_47 = arith.constant 8 : i32
    %214 = arith.muli %c6_i32, %c8_i32_47 : i32
    %215 = tpu.assume_multiple %214, 8 : i32
    %216 = arith.index_cast %215 : i32 to index
    %c0_48 = arith.constant 0 : index
    %217 = vector.load %arg9[%216, %c0_48] : memref<128x384xf32, #tpu.memory_space<vmem>>, vector<8x384xf32>
    %cst_49 = arith.constant dense<0.000000e+00> : vector<8x384xf32>
    %218 = tpu.matmul %212, %7, %cst_49 {dimension_numbers = #tpu.dot_dimension_numbers<[1], [0], [0], [1], [0, 0, 1, 1], [], []>} : vector<8x128xf32>, vector<128x384xf32>, vector<8x384xf32> -> vector<8x384xf32>
    %219 = vector.broadcast %8 : vector<1x384xf32> to vector<8x384xf32>
    %220 = arith.addf %218, %219 : vector<8x384xf32>
    %221 = vector.extract_strided_slice %217 {offsets = [0, 0], sizes = [8, 128], strides = [1, 1]} : vector<8x384xf32> to vector<8x128xf32>
    %222 = vector.extract_strided_slice %220 {offsets = [0, 0], sizes = [8, 128], strides = [1, 1]} : vector<8x384xf32> to vector<8x128xf32>
    %223 = arith.addf %221, %222 : vector<8x128xf32>
    %224 = arith.negf %223 : vector<8x128xf32>
    %225 = math.exp %224 : vector<8x128xf32>
    %cst_50 = arith.constant 1.000000e+00 : f32
    %226 = vector.broadcast %cst_50 : f32 to vector<8x128xf32>
    %227 = arith.addf %226, %225 : vector<8x128xf32>
    %228 = arith.divf %226, %227 : vector<8x128xf32>
    %229 = vector.extract_strided_slice %217 {offsets = [0, 128], sizes = [8, 128], strides = [1, 1]} : vector<8x384xf32> to vector<8x128xf32>
    %230 = vector.extract_strided_slice %220 {offsets = [0, 128], sizes = [8, 128], strides = [1, 1]} : vector<8x384xf32> to vector<8x128xf32>
    %231 = arith.addf %229, %230 : vector<8x128xf32>
    %232 = arith.negf %231 : vector<8x128xf32>
    %233 = math.exp %232 : vector<8x128xf32>
    %cst_51 = arith.constant 1.000000e+00 : f32
    %234 = vector.broadcast %cst_51 : f32 to vector<8x128xf32>
    %235 = arith.addf %234, %233 : vector<8x128xf32>
    %236 = arith.divf %234, %235 : vector<8x128xf32>
    %237 = vector.extract_strided_slice %217 {offsets = [0, 256], sizes = [8, 128], strides = [1, 1]} : vector<8x384xf32> to vector<8x128xf32>
    %238 = vector.extract_strided_slice %220 {offsets = [0, 256], sizes = [8, 128], strides = [1, 1]} : vector<8x384xf32> to vector<8x128xf32>
    %239 = arith.mulf %228, %238 : vector<8x128xf32>
    %240 = arith.addf %237, %239 : vector<8x128xf32>
    %241 = math.tanh %240 : vector<8x128xf32>
    %cst_52 = arith.constant 1.000000e+00 : f32
    %242 = vector.broadcast %cst_52 : f32 to vector<8x128xf32>
    %243 = arith.subf %242, %236 : vector<8x128xf32>
    %244 = arith.mulf %243, %241 : vector<8x128xf32>
    %245 = arith.mulf %236, %212 : vector<8x128xf32>
    %246 = arith.addf %244, %245 : vector<8x128xf32>
    %247 = arith.addf %213, %246 : vector<8x128xf32>
    %c7_i32 = arith.constant 7 : i32
    %c8_i32_53 = arith.constant 8 : i32
    %248 = arith.muli %c7_i32, %c8_i32_53 : i32
    %249 = tpu.assume_multiple %248, 8 : i32
    %250 = arith.index_cast %249 : i32 to index
    %c0_54 = arith.constant 0 : index
    %251 = vector.load %arg9[%250, %c0_54] : memref<128x384xf32, #tpu.memory_space<vmem>>, vector<8x384xf32>
    %cst_55 = arith.constant dense<0.000000e+00> : vector<8x384xf32>
    %252 = tpu.matmul %246, %7, %cst_55 {dimension_numbers = #tpu.dot_dimension_numbers<[1], [0], [0], [1], [0, 0, 1, 1], [], []>} : vector<8x128xf32>, vector<128x384xf32>, vector<8x384xf32> -> vector<8x384xf32>
    %253 = vector.broadcast %8 : vector<1x384xf32> to vector<8x384xf32>
    %254 = arith.addf %252, %253 : vector<8x384xf32>
    %255 = vector.extract_strided_slice %251 {offsets = [0, 0], sizes = [8, 128], strides = [1, 1]} : vector<8x384xf32> to vector<8x128xf32>
    %256 = vector.extract_strided_slice %254 {offsets = [0, 0], sizes = [8, 128], strides = [1, 1]} : vector<8x384xf32> to vector<8x128xf32>
    %257 = arith.addf %255, %256 : vector<8x128xf32>
    %258 = arith.negf %257 : vector<8x128xf32>
    %259 = math.exp %258 : vector<8x128xf32>
    %cst_56 = arith.constant 1.000000e+00 : f32
    %260 = vector.broadcast %cst_56 : f32 to vector<8x128xf32>
    %261 = arith.addf %260, %259 : vector<8x128xf32>
    %262 = arith.divf %260, %261 : vector<8x128xf32>
    %263 = vector.extract_strided_slice %251 {offsets = [0, 128], sizes = [8, 128], strides = [1, 1]} : vector<8x384xf32> to vector<8x128xf32>
    %264 = vector.extract_strided_slice %254 {offsets = [0, 128], sizes = [8, 128], strides = [1, 1]} : vector<8x384xf32> to vector<8x128xf32>
    %265 = arith.addf %263, %264 : vector<8x128xf32>
    %266 = arith.negf %265 : vector<8x128xf32>
    %267 = math.exp %266 : vector<8x128xf32>
    %cst_57 = arith.constant 1.000000e+00 : f32
    %268 = vector.broadcast %cst_57 : f32 to vector<8x128xf32>
    %269 = arith.addf %268, %267 : vector<8x128xf32>
    %270 = arith.divf %268, %269 : vector<8x128xf32>
    %271 = vector.extract_strided_slice %251 {offsets = [0, 256], sizes = [8, 128], strides = [1, 1]} : vector<8x384xf32> to vector<8x128xf32>
    %272 = vector.extract_strided_slice %254 {offsets = [0, 256], sizes = [8, 128], strides = [1, 1]} : vector<8x384xf32> to vector<8x128xf32>
    %273 = arith.mulf %262, %272 : vector<8x128xf32>
    %274 = arith.addf %271, %273 : vector<8x128xf32>
    %275 = math.tanh %274 : vector<8x128xf32>
    %cst_58 = arith.constant 1.000000e+00 : f32
    %276 = vector.broadcast %cst_58 : f32 to vector<8x128xf32>
    %277 = arith.subf %276, %270 : vector<8x128xf32>
    %278 = arith.mulf %277, %275 : vector<8x128xf32>
    %279 = arith.mulf %270, %246 : vector<8x128xf32>
    %280 = arith.addf %278, %279 : vector<8x128xf32>
    %281 = arith.addf %247, %280 : vector<8x128xf32>
    %c8_i32_59 = arith.constant 8 : i32
    %c8_i32_60 = arith.constant 8 : i32
    %282 = arith.muli %c8_i32_59, %c8_i32_60 : i32
    %283 = tpu.assume_multiple %282, 8 : i32
    %284 = arith.index_cast %283 : i32 to index
    %c0_61 = arith.constant 0 : index
    %285 = vector.load %arg9[%284, %c0_61] : memref<128x384xf32, #tpu.memory_space<vmem>>, vector<8x384xf32>
    %cst_62 = arith.constant dense<0.000000e+00> : vector<8x384xf32>
    %286 = tpu.matmul %280, %7, %cst_62 {dimension_numbers = #tpu.dot_dimension_numbers<[1], [0], [0], [1], [0, 0, 1, 1], [], []>} : vector<8x128xf32>, vector<128x384xf32>, vector<8x384xf32> -> vector<8x384xf32>
    %287 = vector.broadcast %8 : vector<1x384xf32> to vector<8x384xf32>
    %288 = arith.addf %286, %287 : vector<8x384xf32>
    %289 = vector.extract_strided_slice %285 {offsets = [0, 0], sizes = [8, 128], strides = [1, 1]} : vector<8x384xf32> to vector<8x128xf32>
    %290 = vector.extract_strided_slice %288 {offsets = [0, 0], sizes = [8, 128], strides = [1, 1]} : vector<8x384xf32> to vector<8x128xf32>
    %291 = arith.addf %289, %290 : vector<8x128xf32>
    %292 = arith.negf %291 : vector<8x128xf32>
    %293 = math.exp %292 : vector<8x128xf32>
    %cst_63 = arith.constant 1.000000e+00 : f32
    %294 = vector.broadcast %cst_63 : f32 to vector<8x128xf32>
    %295 = arith.addf %294, %293 : vector<8x128xf32>
    %296 = arith.divf %294, %295 : vector<8x128xf32>
    %297 = vector.extract_strided_slice %285 {offsets = [0, 128], sizes = [8, 128], strides = [1, 1]} : vector<8x384xf32> to vector<8x128xf32>
    %298 = vector.extract_strided_slice %288 {offsets = [0, 128], sizes = [8, 128], strides = [1, 1]} : vector<8x384xf32> to vector<8x128xf32>
    %299 = arith.addf %297, %298 : vector<8x128xf32>
    %300 = arith.negf %299 : vector<8x128xf32>
    %301 = math.exp %300 : vector<8x128xf32>
    %cst_64 = arith.constant 1.000000e+00 : f32
    %302 = vector.broadcast %cst_64 : f32 to vector<8x128xf32>
    %303 = arith.addf %302, %301 : vector<8x128xf32>
    %304 = arith.divf %302, %303 : vector<8x128xf32>
    %305 = vector.extract_strided_slice %285 {offsets = [0, 256], sizes = [8, 128], strides = [1, 1]} : vector<8x384xf32> to vector<8x128xf32>
    %306 = vector.extract_strided_slice %288 {offsets = [0, 256], sizes = [8, 128], strides = [1, 1]} : vector<8x384xf32> to vector<8x128xf32>
    %307 = arith.mulf %296, %306 : vector<8x128xf32>
    %308 = arith.addf %305, %307 : vector<8x128xf32>
    %309 = math.tanh %308 : vector<8x128xf32>
    %cst_65 = arith.constant 1.000000e+00 : f32
    %310 = vector.broadcast %cst_65 : f32 to vector<8x128xf32>
    %311 = arith.subf %310, %304 : vector<8x128xf32>
    %312 = arith.mulf %311, %309 : vector<8x128xf32>
    %313 = arith.mulf %304, %280 : vector<8x128xf32>
    %314 = arith.addf %312, %313 : vector<8x128xf32>
    %315 = arith.addf %281, %314 : vector<8x128xf32>
    %c9_i32 = arith.constant 9 : i32
    %c8_i32_66 = arith.constant 8 : i32
    %316 = arith.muli %c9_i32, %c8_i32_66 : i32
    %317 = tpu.assume_multiple %316, 8 : i32
    %318 = arith.index_cast %317 : i32 to index
    %c0_67 = arith.constant 0 : index
    %319 = vector.load %arg9[%318, %c0_67] : memref<128x384xf32, #tpu.memory_space<vmem>>, vector<8x384xf32>
    %cst_68 = arith.constant dense<0.000000e+00> : vector<8x384xf32>
    %320 = tpu.matmul %314, %7, %cst_68 {dimension_numbers = #tpu.dot_dimension_numbers<[1], [0], [0], [1], [0, 0, 1, 1], [], []>} : vector<8x128xf32>, vector<128x384xf32>, vector<8x384xf32> -> vector<8x384xf32>
    %321 = vector.broadcast %8 : vector<1x384xf32> to vector<8x384xf32>
    %322 = arith.addf %320, %321 : vector<8x384xf32>
    %323 = vector.extract_strided_slice %319 {offsets = [0, 0], sizes = [8, 128], strides = [1, 1]} : vector<8x384xf32> to vector<8x128xf32>
    %324 = vector.extract_strided_slice %322 {offsets = [0, 0], sizes = [8, 128], strides = [1, 1]} : vector<8x384xf32> to vector<8x128xf32>
    %325 = arith.addf %323, %324 : vector<8x128xf32>
    %326 = arith.negf %325 : vector<8x128xf32>
    %327 = math.exp %326 : vector<8x128xf32>
    %cst_69 = arith.constant 1.000000e+00 : f32
    %328 = vector.broadcast %cst_69 : f32 to vector<8x128xf32>
    %329 = arith.addf %328, %327 : vector<8x128xf32>
    %330 = arith.divf %328, %329 : vector<8x128xf32>
    %331 = vector.extract_strided_slice %319 {offsets = [0, 128], sizes = [8, 128], strides = [1, 1]} : vector<8x384xf32> to vector<8x128xf32>
    %332 = vector.extract_strided_slice %322 {offsets = [0, 128], sizes = [8, 128], strides = [1, 1]} : vector<8x384xf32> to vector<8x128xf32>
    %333 = arith.addf %331, %332 : vector<8x128xf32>
    %334 = arith.negf %333 : vector<8x128xf32>
    %335 = math.exp %334 : vector<8x128xf32>
    %cst_70 = arith.constant 1.000000e+00 : f32
    %336 = vector.broadcast %cst_70 : f32 to vector<8x128xf32>
    %337 = arith.addf %336, %335 : vector<8x128xf32>
    %338 = arith.divf %336, %337 : vector<8x128xf32>
    %339 = vector.extract_strided_slice %319 {offsets = [0, 256], sizes = [8, 128], strides = [1, 1]} : vector<8x384xf32> to vector<8x128xf32>
    %340 = vector.extract_strided_slice %322 {offsets = [0, 256], sizes = [8, 128], strides = [1, 1]} : vector<8x384xf32> to vector<8x128xf32>
    %341 = arith.mulf %330, %340 : vector<8x128xf32>
    %342 = arith.addf %339, %341 : vector<8x128xf32>
    %343 = math.tanh %342 : vector<8x128xf32>
    %cst_71 = arith.constant 1.000000e+00 : f32
    %344 = vector.broadcast %cst_71 : f32 to vector<8x128xf32>
    %345 = arith.subf %344, %338 : vector<8x128xf32>
    %346 = arith.mulf %345, %343 : vector<8x128xf32>
    %347 = arith.mulf %338, %314 : vector<8x128xf32>
    %348 = arith.addf %346, %347 : vector<8x128xf32>
    %349 = arith.addf %315, %348 : vector<8x128xf32>
    %c10_i32 = arith.constant 10 : i32
    %c8_i32_72 = arith.constant 8 : i32
    %350 = arith.muli %c10_i32, %c8_i32_72 : i32
    %351 = tpu.assume_multiple %350, 8 : i32
    %352 = arith.index_cast %351 : i32 to index
    %c0_73 = arith.constant 0 : index
    %353 = vector.load %arg9[%352, %c0_73] : memref<128x384xf32, #tpu.memory_space<vmem>>, vector<8x384xf32>
    %cst_74 = arith.constant dense<0.000000e+00> : vector<8x384xf32>
    %354 = tpu.matmul %348, %7, %cst_74 {dimension_numbers = #tpu.dot_dimension_numbers<[1], [0], [0], [1], [0, 0, 1, 1], [], []>} : vector<8x128xf32>, vector<128x384xf32>, vector<8x384xf32> -> vector<8x384xf32>
    %355 = vector.broadcast %8 : vector<1x384xf32> to vector<8x384xf32>
    %356 = arith.addf %354, %355 : vector<8x384xf32>
    %357 = vector.extract_strided_slice %353 {offsets = [0, 0], sizes = [8, 128], strides = [1, 1]} : vector<8x384xf32> to vector<8x128xf32>
    %358 = vector.extract_strided_slice %356 {offsets = [0, 0], sizes = [8, 128], strides = [1, 1]} : vector<8x384xf32> to vector<8x128xf32>
    %359 = arith.addf %357, %358 : vector<8x128xf32>
    %360 = arith.negf %359 : vector<8x128xf32>
    %361 = math.exp %360 : vector<8x128xf32>
    %cst_75 = arith.constant 1.000000e+00 : f32
    %362 = vector.broadcast %cst_75 : f32 to vector<8x128xf32>
    %363 = arith.addf %362, %361 : vector<8x128xf32>
    %364 = arith.divf %362, %363 : vector<8x128xf32>
    %365 = vector.extract_strided_slice %353 {offsets = [0, 128], sizes = [8, 128], strides = [1, 1]} : vector<8x384xf32> to vector<8x128xf32>
    %366 = vector.extract_strided_slice %356 {offsets = [0, 128], sizes = [8, 128], strides = [1, 1]} : vector<8x384xf32> to vector<8x128xf32>
    %367 = arith.addf %365, %366 : vector<8x128xf32>
    %368 = arith.negf %367 : vector<8x128xf32>
    %369 = math.exp %368 : vector<8x128xf32>
    %cst_76 = arith.constant 1.000000e+00 : f32
    %370 = vector.broadcast %cst_76 : f32 to vector<8x128xf32>
    %371 = arith.addf %370, %369 : vector<8x128xf32>
    %372 = arith.divf %370, %371 : vector<8x128xf32>
    %373 = vector.extract_strided_slice %353 {offsets = [0, 256], sizes = [8, 128], strides = [1, 1]} : vector<8x384xf32> to vector<8x128xf32>
    %374 = vector.extract_strided_slice %356 {offsets = [0, 256], sizes = [8, 128], strides = [1, 1]} : vector<8x384xf32> to vector<8x128xf32>
    %375 = arith.mulf %364, %374 : vector<8x128xf32>
    %376 = arith.addf %373, %375 : vector<8x128xf32>
    %377 = math.tanh %376 : vector<8x128xf32>
    %cst_77 = arith.constant 1.000000e+00 : f32
    %378 = vector.broadcast %cst_77 : f32 to vector<8x128xf32>
    %379 = arith.subf %378, %372 : vector<8x128xf32>
    %380 = arith.mulf %379, %377 : vector<8x128xf32>
    %381 = arith.mulf %372, %348 : vector<8x128xf32>
    %382 = arith.addf %380, %381 : vector<8x128xf32>
    %383 = arith.addf %349, %382 : vector<8x128xf32>
    %c11_i32 = arith.constant 11 : i32
    %c8_i32_78 = arith.constant 8 : i32
    %384 = arith.muli %c11_i32, %c8_i32_78 : i32
    %385 = tpu.assume_multiple %384, 8 : i32
    %386 = arith.index_cast %385 : i32 to index
    %c0_79 = arith.constant 0 : index
    %387 = vector.load %arg9[%386, %c0_79] : memref<128x384xf32, #tpu.memory_space<vmem>>, vector<8x384xf32>
    %cst_80 = arith.constant dense<0.000000e+00> : vector<8x384xf32>
    %388 = tpu.matmul %382, %7, %cst_80 {dimension_numbers = #tpu.dot_dimension_numbers<[1], [0], [0], [1], [0, 0, 1, 1], [], []>} : vector<8x128xf32>, vector<128x384xf32>, vector<8x384xf32> -> vector<8x384xf32>
    %389 = vector.broadcast %8 : vector<1x384xf32> to vector<8x384xf32>
    %390 = arith.addf %388, %389 : vector<8x384xf32>
    %391 = vector.extract_strided_slice %387 {offsets = [0, 0], sizes = [8, 128], strides = [1, 1]} : vector<8x384xf32> to vector<8x128xf32>
    %392 = vector.extract_strided_slice %390 {offsets = [0, 0], sizes = [8, 128], strides = [1, 1]} : vector<8x384xf32> to vector<8x128xf32>
    %393 = arith.addf %391, %392 : vector<8x128xf32>
    %394 = arith.negf %393 : vector<8x128xf32>
    %395 = math.exp %394 : vector<8x128xf32>
    %cst_81 = arith.constant 1.000000e+00 : f32
    %396 = vector.broadcast %cst_81 : f32 to vector<8x128xf32>
    %397 = arith.addf %396, %395 : vector<8x128xf32>
    %398 = arith.divf %396, %397 : vector<8x128xf32>
    %399 = vector.extract_strided_slice %387 {offsets = [0, 128], sizes = [8, 128], strides = [1, 1]} : vector<8x384xf32> to vector<8x128xf32>
    %400 = vector.extract_strided_slice %390 {offsets = [0, 128], sizes = [8, 128], strides = [1, 1]} : vector<8x384xf32> to vector<8x128xf32>
    %401 = arith.addf %399, %400 : vector<8x128xf32>
    %402 = arith.negf %401 : vector<8x128xf32>
    %403 = math.exp %402 : vector<8x128xf32>
    %cst_82 = arith.constant 1.000000e+00 : f32
    %404 = vector.broadcast %cst_82 : f32 to vector<8x128xf32>
    %405 = arith.addf %404, %403 : vector<8x128xf32>
    %406 = arith.divf %404, %405 : vector<8x128xf32>
    %407 = vector.extract_strided_slice %387 {offsets = [0, 256], sizes = [8, 128], strides = [1, 1]} : vector<8x384xf32> to vector<8x128xf32>
    %408 = vector.extract_strided_slice %390 {offsets = [0, 256], sizes = [8, 128], strides = [1, 1]} : vector<8x384xf32> to vector<8x128xf32>
    %409 = arith.mulf %398, %408 : vector<8x128xf32>
    %410 = arith.addf %407, %409 : vector<8x128xf32>
    %411 = math.tanh %410 : vector<8x128xf32>
    %cst_83 = arith.constant 1.000000e+00 : f32
    %412 = vector.broadcast %cst_83 : f32 to vector<8x128xf32>
    %413 = arith.subf %412, %406 : vector<8x128xf32>
    %414 = arith.mulf %413, %411 : vector<8x128xf32>
    %415 = arith.mulf %406, %382 : vector<8x128xf32>
    %416 = arith.addf %414, %415 : vector<8x128xf32>
    %417 = arith.addf %383, %416 : vector<8x128xf32>
    %c12_i32 = arith.constant 12 : i32
    %c8_i32_84 = arith.constant 8 : i32
    %418 = arith.muli %c12_i32, %c8_i32_84 : i32
    %419 = tpu.assume_multiple %418, 8 : i32
    %420 = arith.index_cast %419 : i32 to index
    %c0_85 = arith.constant 0 : index
    %421 = vector.load %arg9[%420, %c0_85] : memref<128x384xf32, #tpu.memory_space<vmem>>, vector<8x384xf32>
    %cst_86 = arith.constant dense<0.000000e+00> : vector<8x384xf32>
    %422 = tpu.matmul %416, %7, %cst_86 {dimension_numbers = #tpu.dot_dimension_numbers<[1], [0], [0], [1], [0, 0, 1, 1], [], []>} : vector<8x128xf32>, vector<128x384xf32>, vector<8x384xf32> -> vector<8x384xf32>
    %423 = vector.broadcast %8 : vector<1x384xf32> to vector<8x384xf32>
    %424 = arith.addf %422, %423 : vector<8x384xf32>
    %425 = vector.extract_strided_slice %421 {offsets = [0, 0], sizes = [8, 128], strides = [1, 1]} : vector<8x384xf32> to vector<8x128xf32>
    %426 = vector.extract_strided_slice %424 {offsets = [0, 0], sizes = [8, 128], strides = [1, 1]} : vector<8x384xf32> to vector<8x128xf32>
    %427 = arith.addf %425, %426 : vector<8x128xf32>
    %428 = arith.negf %427 : vector<8x128xf32>
    %429 = math.exp %428 : vector<8x128xf32>
    %cst_87 = arith.constant 1.000000e+00 : f32
    %430 = vector.broadcast %cst_87 : f32 to vector<8x128xf32>
    %431 = arith.addf %430, %429 : vector<8x128xf32>
    %432 = arith.divf %430, %431 : vector<8x128xf32>
    %433 = vector.extract_strided_slice %421 {offsets = [0, 128], sizes = [8, 128], strides = [1, 1]} : vector<8x384xf32> to vector<8x128xf32>
    %434 = vector.extract_strided_slice %424 {offsets = [0, 128], sizes = [8, 128], strides = [1, 1]} : vector<8x384xf32> to vector<8x128xf32>
    %435 = arith.addf %433, %434 : vector<8x128xf32>
    %436 = arith.negf %435 : vector<8x128xf32>
    %437 = math.exp %436 : vector<8x128xf32>
    %cst_88 = arith.constant 1.000000e+00 : f32
    %438 = vector.broadcast %cst_88 : f32 to vector<8x128xf32>
    %439 = arith.addf %438, %437 : vector<8x128xf32>
    %440 = arith.divf %438, %439 : vector<8x128xf32>
    %441 = vector.extract_strided_slice %421 {offsets = [0, 256], sizes = [8, 128], strides = [1, 1]} : vector<8x384xf32> to vector<8x128xf32>
    %442 = vector.extract_strided_slice %424 {offsets = [0, 256], sizes = [8, 128], strides = [1, 1]} : vector<8x384xf32> to vector<8x128xf32>
    %443 = arith.mulf %432, %442 : vector<8x128xf32>
    %444 = arith.addf %441, %443 : vector<8x128xf32>
    %445 = math.tanh %444 : vector<8x128xf32>
    %cst_89 = arith.constant 1.000000e+00 : f32
    %446 = vector.broadcast %cst_89 : f32 to vector<8x128xf32>
    %447 = arith.subf %446, %440 : vector<8x128xf32>
    %448 = arith.mulf %447, %445 : vector<8x128xf32>
    %449 = arith.mulf %440, %416 : vector<8x128xf32>
    %450 = arith.addf %448, %449 : vector<8x128xf32>
    %451 = arith.addf %417, %450 : vector<8x128xf32>
    %c13_i32 = arith.constant 13 : i32
    %c8_i32_90 = arith.constant 8 : i32
    %452 = arith.muli %c13_i32, %c8_i32_90 : i32
    %453 = tpu.assume_multiple %452, 8 : i32
    %454 = arith.index_cast %453 : i32 to index
    %c0_91 = arith.constant 0 : index
    %455 = vector.load %arg9[%454, %c0_91] : memref<128x384xf32, #tpu.memory_space<vmem>>, vector<8x384xf32>
    %cst_92 = arith.constant dense<0.000000e+00> : vector<8x384xf32>
    %456 = tpu.matmul %450, %7, %cst_92 {dimension_numbers = #tpu.dot_dimension_numbers<[1], [0], [0], [1], [0, 0, 1, 1], [], []>} : vector<8x128xf32>, vector<128x384xf32>, vector<8x384xf32> -> vector<8x384xf32>
    %457 = vector.broadcast %8 : vector<1x384xf32> to vector<8x384xf32>
    %458 = arith.addf %456, %457 : vector<8x384xf32>
    %459 = vector.extract_strided_slice %455 {offsets = [0, 0], sizes = [8, 128], strides = [1, 1]} : vector<8x384xf32> to vector<8x128xf32>
    %460 = vector.extract_strided_slice %458 {offsets = [0, 0], sizes = [8, 128], strides = [1, 1]} : vector<8x384xf32> to vector<8x128xf32>
    %461 = arith.addf %459, %460 : vector<8x128xf32>
    %462 = arith.negf %461 : vector<8x128xf32>
    %463 = math.exp %462 : vector<8x128xf32>
    %cst_93 = arith.constant 1.000000e+00 : f32
    %464 = vector.broadcast %cst_93 : f32 to vector<8x128xf32>
    %465 = arith.addf %464, %463 : vector<8x128xf32>
    %466 = arith.divf %464, %465 : vector<8x128xf32>
    %467 = vector.extract_strided_slice %455 {offsets = [0, 128], sizes = [8, 128], strides = [1, 1]} : vector<8x384xf32> to vector<8x128xf32>
    %468 = vector.extract_strided_slice %458 {offsets = [0, 128], sizes = [8, 128], strides = [1, 1]} : vector<8x384xf32> to vector<8x128xf32>
    %469 = arith.addf %467, %468 : vector<8x128xf32>
    %470 = arith.negf %469 : vector<8x128xf32>
    %471 = math.exp %470 : vector<8x128xf32>
    %cst_94 = arith.constant 1.000000e+00 : f32
    %472 = vector.broadcast %cst_94 : f32 to vector<8x128xf32>
    %473 = arith.addf %472, %471 : vector<8x128xf32>
    %474 = arith.divf %472, %473 : vector<8x128xf32>
    %475 = vector.extract_strided_slice %455 {offsets = [0, 256], sizes = [8, 128], strides = [1, 1]} : vector<8x384xf32> to vector<8x128xf32>
    %476 = vector.extract_strided_slice %458 {offsets = [0, 256], sizes = [8, 128], strides = [1, 1]} : vector<8x384xf32> to vector<8x128xf32>
    %477 = arith.mulf %466, %476 : vector<8x128xf32>
    %478 = arith.addf %475, %477 : vector<8x128xf32>
    %479 = math.tanh %478 : vector<8x128xf32>
    %cst_95 = arith.constant 1.000000e+00 : f32
    %480 = vector.broadcast %cst_95 : f32 to vector<8x128xf32>
    %481 = arith.subf %480, %474 : vector<8x128xf32>
    %482 = arith.mulf %481, %479 : vector<8x128xf32>
    %483 = arith.mulf %474, %450 : vector<8x128xf32>
    %484 = arith.addf %482, %483 : vector<8x128xf32>
    %485 = arith.addf %451, %484 : vector<8x128xf32>
    %c14_i32 = arith.constant 14 : i32
    %c8_i32_96 = arith.constant 8 : i32
    %486 = arith.muli %c14_i32, %c8_i32_96 : i32
    %487 = tpu.assume_multiple %486, 8 : i32
    %488 = arith.index_cast %487 : i32 to index
    %c0_97 = arith.constant 0 : index
    %489 = vector.load %arg9[%488, %c0_97] : memref<128x384xf32, #tpu.memory_space<vmem>>, vector<8x384xf32>
    %cst_98 = arith.constant dense<0.000000e+00> : vector<8x384xf32>
    %490 = tpu.matmul %484, %7, %cst_98 {dimension_numbers = #tpu.dot_dimension_numbers<[1], [0], [0], [1], [0, 0, 1, 1], [], []>} : vector<8x128xf32>, vector<128x384xf32>, vector<8x384xf32> -> vector<8x384xf32>
    %491 = vector.broadcast %8 : vector<1x384xf32> to vector<8x384xf32>
    %492 = arith.addf %490, %491 : vector<8x384xf32>
    %493 = vector.extract_strided_slice %489 {offsets = [0, 0], sizes = [8, 128], strides = [1, 1]} : vector<8x384xf32> to vector<8x128xf32>
    %494 = vector.extract_strided_slice %492 {offsets = [0, 0], sizes = [8, 128], strides = [1, 1]} : vector<8x384xf32> to vector<8x128xf32>
    %495 = arith.addf %493, %494 : vector<8x128xf32>
    %496 = arith.negf %495 : vector<8x128xf32>
    %497 = math.exp %496 : vector<8x128xf32>
    %cst_99 = arith.constant 1.000000e+00 : f32
    %498 = vector.broadcast %cst_99 : f32 to vector<8x128xf32>
    %499 = arith.addf %498, %497 : vector<8x128xf32>
    %500 = arith.divf %498, %499 : vector<8x128xf32>
    %501 = vector.extract_strided_slice %489 {offsets = [0, 128], sizes = [8, 128], strides = [1, 1]} : vector<8x384xf32> to vector<8x128xf32>
    %502 = vector.extract_strided_slice %492 {offsets = [0, 128], sizes = [8, 128], strides = [1, 1]} : vector<8x384xf32> to vector<8x128xf32>
    %503 = arith.addf %501, %502 : vector<8x128xf32>
    %504 = arith.negf %503 : vector<8x128xf32>
    %505 = math.exp %504 : vector<8x128xf32>
    %cst_100 = arith.constant 1.000000e+00 : f32
    %506 = vector.broadcast %cst_100 : f32 to vector<8x128xf32>
    %507 = arith.addf %506, %505 : vector<8x128xf32>
    %508 = arith.divf %506, %507 : vector<8x128xf32>
    %509 = vector.extract_strided_slice %489 {offsets = [0, 256], sizes = [8, 128], strides = [1, 1]} : vector<8x384xf32> to vector<8x128xf32>
    %510 = vector.extract_strided_slice %492 {offsets = [0, 256], sizes = [8, 128], strides = [1, 1]} : vector<8x384xf32> to vector<8x128xf32>
    %511 = arith.mulf %500, %510 : vector<8x128xf32>
    %512 = arith.addf %509, %511 : vector<8x128xf32>
    %513 = math.tanh %512 : vector<8x128xf32>
    %cst_101 = arith.constant 1.000000e+00 : f32
    %514 = vector.broadcast %cst_101 : f32 to vector<8x128xf32>
    %515 = arith.subf %514, %508 : vector<8x128xf32>
    %516 = arith.mulf %515, %513 : vector<8x128xf32>
    %517 = arith.mulf %508, %484 : vector<8x128xf32>
    %518 = arith.addf %516, %517 : vector<8x128xf32>
    %519 = arith.addf %485, %518 : vector<8x128xf32>
    %c15_i32 = arith.constant 15 : i32
    %c8_i32_102 = arith.constant 8 : i32
    %520 = arith.muli %c15_i32, %c8_i32_102 : i32
    %521 = tpu.assume_multiple %520, 8 : i32
    %522 = arith.index_cast %521 : i32 to index
    %c0_103 = arith.constant 0 : index
    %523 = vector.load %arg9[%522, %c0_103] : memref<128x384xf32, #tpu.memory_space<vmem>>, vector<8x384xf32>
    %cst_104 = arith.constant dense<0.000000e+00> : vector<8x384xf32>
    %524 = tpu.matmul %518, %7, %cst_104 {dimension_numbers = #tpu.dot_dimension_numbers<[1], [0], [0], [1], [0, 0, 1, 1], [], []>} : vector<8x128xf32>, vector<128x384xf32>, vector<8x384xf32> -> vector<8x384xf32>
    %525 = vector.broadcast %8 : vector<1x384xf32> to vector<8x384xf32>
    %526 = arith.addf %524, %525 : vector<8x384xf32>
    %527 = vector.extract_strided_slice %523 {offsets = [0, 0], sizes = [8, 128], strides = [1, 1]} : vector<8x384xf32> to vector<8x128xf32>
    %528 = vector.extract_strided_slice %526 {offsets = [0, 0], sizes = [8, 128], strides = [1, 1]} : vector<8x384xf32> to vector<8x128xf32>
    %529 = arith.addf %527, %528 : vector<8x128xf32>
    %530 = arith.negf %529 : vector<8x128xf32>
    %531 = math.exp %530 : vector<8x128xf32>
    %cst_105 = arith.constant 1.000000e+00 : f32
    %532 = vector.broadcast %cst_105 : f32 to vector<8x128xf32>
    %533 = arith.addf %532, %531 : vector<8x128xf32>
    %534 = arith.divf %532, %533 : vector<8x128xf32>
    %535 = vector.extract_strided_slice %523 {offsets = [0, 128], sizes = [8, 128], strides = [1, 1]} : vector<8x384xf32> to vector<8x128xf32>
    %536 = vector.extract_strided_slice %526 {offsets = [0, 128], sizes = [8, 128], strides = [1, 1]} : vector<8x384xf32> to vector<8x128xf32>
    %537 = arith.addf %535, %536 : vector<8x128xf32>
    %538 = arith.negf %537 : vector<8x128xf32>
    %539 = math.exp %538 : vector<8x128xf32>
    %cst_106 = arith.constant 1.000000e+00 : f32
    %540 = vector.broadcast %cst_106 : f32 to vector<8x128xf32>
    %541 = arith.addf %540, %539 : vector<8x128xf32>
    %542 = arith.divf %540, %541 : vector<8x128xf32>
    %543 = vector.extract_strided_slice %523 {offsets = [0, 256], sizes = [8, 128], strides = [1, 1]} : vector<8x384xf32> to vector<8x128xf32>
    %544 = vector.extract_strided_slice %526 {offsets = [0, 256], sizes = [8, 128], strides = [1, 1]} : vector<8x384xf32> to vector<8x128xf32>
    %545 = arith.mulf %534, %544 : vector<8x128xf32>
    %546 = arith.addf %543, %545 : vector<8x128xf32>
    %547 = math.tanh %546 : vector<8x128xf32>
    %cst_107 = arith.constant 1.000000e+00 : f32
    %548 = vector.broadcast %cst_107 : f32 to vector<8x128xf32>
    %549 = arith.subf %548, %542 : vector<8x128xf32>
    %550 = arith.mulf %549, %547 : vector<8x128xf32>
    %551 = arith.mulf %542, %518 : vector<8x128xf32>
    %552 = arith.addf %550, %551 : vector<8x128xf32>
    %553 = arith.addf %519, %552 : vector<8x128xf32>
    %c16_i32 = arith.constant 16 : i32
    %cst_108 = arith.constant 6.250000e-02 : f32
    %554 = vector.broadcast %cst_108 : f32 to vector<8x128xf32>
    %555 = arith.mulf %553, %554 : vector<8x128xf32>
    %c0_109 = arith.constant 0 : index
    %c0_110 = arith.constant 0 : index
    %556 = vector.load %arg6[%c0_109, %c0_110] : memref<128x1xf32, #tpu.memory_space<vmem>>, vector<128x1xf32>
    %cst_111 = arith.constant dense<0.000000e+00> : vector<8x1xf32>
    %557 = tpu.matmul %555, %556, %cst_111 {dimension_numbers = #tpu.dot_dimension_numbers<[1], [0], [0], [1], [0, 0, 1, 1], [], []>} : vector<8x128xf32>, vector<128x1xf32>, vector<8x1xf32> -> vector<8x1xf32>
    %c0_112 = arith.constant 0 : index
    %c0_113 = arith.constant 0 : index
    %558 = vector.load %arg7[%c0_112, %c0_113] : memref<1x1xf32, #tpu.memory_space<vmem>>, vector<1x1xf32>
    %559 = vector.broadcast %558 : vector<1x1xf32> to vector<8x1xf32>
    %560 = arith.addf %557, %559 : vector<8x1xf32>
    %561 = arith.negf %560 : vector<8x1xf32>
    %562 = math.exp %561 : vector<8x1xf32>
    %cst_114 = arith.constant 1.000000e+00 : f32
    %563 = vector.broadcast %cst_114 : f32 to vector<8x1xf32>
    %564 = arith.addf %563, %562 : vector<8x1xf32>
    %565 = arith.divf %563, %564 : vector<8x1xf32>
    %c0_115 = arith.constant 0 : index
    %c0_116 = arith.constant 0 : index
    %566 = vector.load %arg8[%c0_115, %c0_116] : memref<8x1xf32, #tpu.memory_space<vmem>>, vector<8x1xf32>
    tpu.vector_store %arg8[%c0_115, %c0_116], %565 {strides = array<i32>} : memref<8x1xf32, #tpu.memory_space<vmem>>, vector<8x1xf32>,
    return
  }
  func.func @transform_0(%arg0: i32) -> (i32, i32) {
    %c0_i32 = arith.constant 0 : i32
    %c0_i32_0 = arith.constant 0 : i32
    %c0_i32_1 = arith.constant 0 : i32
    return %c0_i32, %c0_i32_0 : i32, i32
  }
  func.func @transform_1(%arg0: i32) -> (i32, i32) {
    %c0_i32 = arith.constant 0 : i32
    %c0_i32_0 = arith.constant 0 : i32
    %c0_i32_1 = arith.constant 0 : i32
    return %c0_i32, %c0_i32_0 : i32, i32
  }
  func.func @transform_2(%arg0: i32) -> (i32, i32) {
    %c0_i32 = arith.constant 0 : i32
    %c0_i32_0 = arith.constant 0 : i32
    %c0_i32_1 = arith.constant 0 : i32
    return %c0_i32, %c0_i32_0 : i32, i32
  }
  func.func @transform_3(%arg0: i32) -> (i32, i32) {
    %c0_i32 = arith.constant 0 : i32
    %c0_i32_0 = arith.constant 0 : i32
    %c0_i32_1 = arith.constant 0 : i32
    return %c0_i32, %c0_i32_0 : i32, i32
  }
  func.func @transform_4(%arg0: i32) -> (i32, i32) {
    %c0_i32 = arith.constant 0 : i32
    %c0_i32_0 = arith.constant 0 : i32
    %c0_i32_1 = arith.constant 0 : i32
    return %c0_i32, %c0_i32_0 : i32, i32
  }
  func.func @transform_5(%arg0: i32) -> (i32, i32) {
    %c0_i32 = arith.constant 0 : i32
    %c0_i32_0 = arith.constant 0 : i32
    %c0_i32_1 = arith.constant 0 : i32
    return %c0_i32, %c0_i32_0 : i32, i32
  }
  func.func @transform_6(%arg0: i32) -> (i32, i32) {
    %c0_i32 = arith.constant 0 : i32
    %c0_i32_0 = arith.constant 0 : i32
    %c0_i32_1 = arith.constant 0 : i32
    return %c0_i32, %c0_i32_0 : i32, i32
  }
  func.func @transform_7(%arg0: i32) -> (i32, i32) {
    %c0_i32 = arith.constant 0 : i32
    %c0_i32_0 = arith.constant 0 : i32
    %c0_i32_1 = arith.constant 0 : i32
    return %c0_i32, %c0_i32_0 : i32, i32
  }
}

</mosaic_0001>

<bundles_post_ra>
// kernel: tpu_custom_call.1
= control target key start
LH: loop header
LB: loop body
LE: loop exit
PB: predicated region body
PF: predicated region fallthrough
CT: control target
= control target key end

     0   :  { %s6672_s0 = inlined_call_operand.vmem [shape: f32[128,32], index: 0, kind: input, shape index: {}]   ;;  %s6673_s1 = inlined_call_operand.vmem [shape: f32[32,384], index: 1, kind: input, shape index: {}]   ;;  %s6674_s2 = inlined_call_operand.vmem [shape: f32[1,384], index: 2, kind: input, shape index: {}]   ;;  %s6675_s3 = inlined_call_operand.hbm [shape: f32[128,384], index: 3, kind: input, shape index: {}]   ;;  %s6676_s4 = inlined_call_operand.vmem [shape: f32[1,384], index: 4, kind: input, shape index: {}]   ;;  %s6677_s5 = inlined_call_operand.vmem [shape: f32[128,1], index: 5, kind: input, shape index: {}]   ;;  %s6678_s6 = inlined_call_operand.<no memory space> [shape: f32[1,1], index: 6, kind: input, shape index: {}]   ;;  %s6679_s7 = inlined_call_operand.vmem [shape: f32[8,1], index: 7, kind: output, shape index: {}]  }
   0x1   :  { %v12_v0 = vstv %s6678_s6 }
   0x2   :  { %13 = vst [vmem:[#allocation3] sm:$0x1] %v12_v0 }
   0x3   :  { %14 = vsyncpa [#allocation5], 0  ;;  %s5609_s26 = smov [#allocation4]   ;;  %s5585_s30 = scalar_lea.hbm %s6675_s3, 6144 }
   0x4   :  { %s26_s27 = sshll.u32 %s5609_s26, 4  ;;  %p5586_p0 = scmp.ne.s32.totalorder %s6675_s3, %s5585_s30  ;;  %s27_s27 = int_to_ptr.vmem [resolvable:$true] %s26_s27 }
   0x5   :  { %p5589_p1 = scmp.lt.u32.totalorder %s5585_s30, %s6675_s3 }
   0x7   :  { %p5591_p2 = pnand %p5589_p1, %p5586_p0 }
   0x9   :  { %5594 = shalt.err (!%p5591_p2)
}
   0xa   :  { %s5595_s6 = scalar_lea.vmem %s27_s27, 6144  ;;  %p5600_p4 = scmp.lt.s32.totalorder %s27_s27, %s27_s27 }
   0xb   :  { %p5596_p3 = scmp.ne.s32.totalorder %s27_s27, %s5595_s6  ;;  %p5601_p5 = scmp.lt.s32.totalorder %s5595_s6, %s5595_s6 }
   0xd   :  { %p5602_p6 = por %p5601_p5, %p5600_p4 }
   0xf   :  { %p5603_p7 = pnand %p5602_p6, %p5596_p3 }
  0x11   :  { %5606 = shalt.err (!%p5603_p7)
}
  0x12   :  { %s5610_s12 = smov 384   ;;  %s5611_s13 = smov 24  }
  0x13   :  { %32 = dma.hbm_to_vmem [thread:$0]  %s6675_s3, 6144, %s27_s27, [#allocation5], %s5610_s12, %s5610_s12, %s5611_s13  }
  0x14   :  { %5607 = dma.done.wait [#allocation5], 6144  }
  0x15   :  { %5608 = vsyncadd [#allocation5], 4294961152  ;;  %v5612_v1 = vmov 0.0   ;;  %v59_v2 = vld [vmem:[%s6673_s1 + $0x8] sm:$0xff]  ;;  %v62_v3 = vld [vmem:[%s6673_s1 + $0x20] sm:$0xff]  ;;  %vm87_vm0 = vcmask 261120  }
  0x16   :  { %200 = vmatprep.mubr.f32.mxu0 %v5612_v1  ;;  %v58_v4 = vld [vmem:[%s6673_s1] sm:$0xff]  ;;  %v4383_v5 = vpack.c.bf16 %v62_v3, %v59_v2  ;;  %v61_v6 = vld [vmem:[%s6673_s1 + $0x18] sm:$0xff]  ;;  %v68_v8 = vld [vmem:[%s6673_s1 + $0x50] sm:$0xff]  ;;  %v5613_v0 = vmov 0.0|0.0   ;;  %vm5614_vm1 = vmmov 0   ;;  %vm3359_vm2 = vcmask 7168  }
  0x17   :  { %v65_v7 = vld [vmem:[%s6673_s1 + $0x38] sm:$0xff]  ;;  %v4385_v9 = vpack.c.bf16 %v61_v6, %v58_v4  ;;  %v64_v11 = vld [vmem:[%s6673_s1 + $0x30] sm:$0xff]  ;;  %v67_v12 = vld [vmem:[%s6673_s1 + $0x48] sm:$0xff] }
  0x18   :  { %v4387_v10 = vpack.c.bf16 %v68_v8, %v65_v7  ;;  %v42_v13 = vld [vmem:[%s6672_s0] sm:$0xff]  ;;  %4384 = vmatprep.subr.bf16.mxu0 %v4383_v5  ;;  %v491_v14 = vld [vmem:[#allocation4 + $0x8] sm:$0xff]  ;;  %v4389_v16 = vpack.c.bf16 %v67_v12, %v64_v11  ;;  %v500_v21 = vld [vmem:[#allocation4 + $0x50] sm:$0xff] }
  0x19   :  { %v494_v15 = vld [vmem:[#allocation4 + $0x20] sm:$0xff]  ;;  %3764 = vmatprep.mubr.msk.f32.mxu1 %vm87_vm0, %v42_v13  ;;  %4386 = vmatpush1.bf16.msra.mxu0 %v4385_v9  ;;  %v493_v19 = vld [vmem:[#allocation4 + $0x18] sm:$0xff]  ;;  %v496_v24 = vld [vmem:[#allocation4 + $0x30] sm:$0xff] }
  0x1a   :  { %4388 = vmatprep.subr.bf16.mxu0 %v4387_v10  ;;  %v5699_v17 = vpack.c.bf16 %v494_v15, %v491_v14  ;;  %v490_v18 = vld [vmem:[#allocation4] sm:$0xff]  ;;  %v497_v20 = vld [vmem:[#allocation4 + $0x38] sm:$0xff]  ;;  %v499_v25 = vld [vmem:[#allocation4 + $0x48] sm:$0xff] }
  0x1b   :  { %v5701_v22 = vpack.c.bf16 %v493_v19, %v490_v18  ;;  %v5704_v23 = vpack.c.bf16 %v500_v21, %v497_v20  ;;  %v503_v26 = vld [vmem:[#allocation4 + $0x68] sm:$0xff]  ;;  %v506_v27 = vld [vmem:[#allocation4 + $0x80] sm:$0xff]  ;;  %v5714_v29 = vpack.c.bf16 %v499_v25, %v496_v24  ;;  %v505_v32 = vld [vmem:[#allocation4 + $0x78] sm:$0xff] }
  0x1c   :  { %v5712_v28 = vld [vmem:[%s6672_s0 + $0x8] sm:$0xff]  ;;  %v5717_v30 = vpack.c.bf16 %v506_v27, %v503_v26  ;;  %v509_v33 = vld [vmem:[#allocation4 + $0x98] sm:$0xff]  ;;  %v512_v34 = vld [vmem:[#allocation4 + $0xb0] sm:$0xff] }
  0x1d   :  { %4390 = vmatpush1.bf16.msra.mxu0 %v4389_v16  ;;  %v502_v31 = vld [vmem:[#allocation4 + $0x60] sm:$0xff]  ;;  %v44_v35 = vld [vmem:[%s6672_s0 + $0x10] sm:$0xff]  ;;  %v5735_v40 = vpack.c.bf16 %v512_v34, %v509_v33  ;;  %v69_v44 = vld [vmem:[%s6673_s1 + $0x58] sm:$0xff] }
  0x1e   :  { %4400 = vmatprep.subr.bf16.mxu0 %v5699_v17  ;;  %v5726_v36 = vpack.c.bf16 %v505_v32, %v502_v31  ;;  %v508_v37 = vld [vmem:[#allocation4 + $0x90] sm:$0xff]  ;;  %v63_v39 = vld [vmem:[%s6673_s1 + $0x28] sm:$0xff]  ;;  %v66_v43 = vld [vmem:[%s6673_s1 + $0x40] sm:$0xff] }
  0x1f   :  { %v60_v38 = vld [vmem:[%s6673_s1 + $0x10] sm:$0xff]  ;;  %v518_v46 = vld [vmem:[#allocation4 + $0xe0] sm:$0xff]  ;;  %v4395_v47 = vpack.c.bf16 %v69_v44, %v66_v43  ;;  %v45_v48 = vld [vmem:[%s6672_s0 + $0x18] sm:$0xff] }
  0x20   :  { %3381 = vmatmul.mubr.msk.f32.vlgmr.msra.gmra.mrb[0].mxu0 %vm87_vm0, %v42_v13  ;;  %v511_v41 = vld [vmem:[#allocation4 + $0xa8] sm:$0xff]  ;;  %v4391_v42 = vpack.c.bf16 %v63_v39, %v60_v38  ;;  %v514_v51 = vld [vmem:[#allocation4 + $0xc0] sm:$0xff]  ;;  %v517_v52 = vld [vmem:[#allocation4 + $0xd8] sm:$0xff] }
  0x21   :  { %4402 = vmatpush1.bf16.msra.mxu0 %v5701_v22  ;;  %206 = vmatprep.mubr.f32.mxu0 %v5612_v1  ;;  %v515_v45 = vld [vmem:[#allocation4 + $0xc8] sm:$0xff]  ;;  %v5749_v49 = vpack.c.bf16 %v511_v41, %v508_v37  ;;  %v521_v53 = vld [vmem:[#allocation4 + $0xf8] sm:$0xff]  ;;  %v524_v54 = vld [vmem:[#allocation4 + $0x110] sm:$0xff]  ;;  %v5760_v58 = vpack.c.bf16 %v517_v52, %v514_v51 }
  0x22   :  { %4404 = vmatprep.subr.bf16.mxu0 %v5704_v23  ;;  %4392 = vmatprep.subr.bf16.mxu1 %v4391_v42  ;;  %v5752_v50 = vpack.c.bf16 %v518_v46, %v515_v45  ;;  %v492_v55 = vld [vmem:[#allocation4 + $0x10] sm:$0xff]  ;;  %v495_v56 = vld [vmem:[#allocation4 + $0x28] sm:$0xff]  ;;  %v46_v57 = vld [vmem:[%s6672_s0 + $0x20] sm:$0xff]  ;;  %v5763_v59 = vpack.c.bf16 %v524_v54, %v521_v53 }
  0x23   :  { %4394 = vmatpush3.bf16.msra.mxu1 %v4391_v42  ;;  %v520_v60 = vld [vmem:[#allocation4 + $0xf0] sm:$0xff]  ;;  %v523_v61 = vld [vmem:[#allocation4 + $0x108] sm:$0xff]  ;;  %v530_v63 = vld [vmem:[#allocation4 + $0x140] sm:$0xff]  ;;  %v5766_v2 = vpack.c.bf16 %v495_v56, %v492_v55  ;;  %v72_v55 = vlaneseq }
  0x24   :  { %3382 = vmatmul.mubr.msk.f32.gmra.mrb[2].mxu0 %vm87_vm0, %v5712_v28  ;;  %4396 = vmatprep.subr.bf16.mxu1 %v4395_v47  ;;  %v527_v62 = vld [vmem:[#allocation4 + $0x128] sm:$0xff]  ;;  %v498_v3 = vld [vmem:[#allocation4 + $0x40] sm:$0xff]  ;;  %v501_v4 = vld [vmem:[#allocation4 + $0x58] sm:$0xff]  ;;  %v5774_v6 = vpack.c.bf16 %v523_v61, %v520_v60 }
  0x25   :  { %212 = vmatprep.mubr.f32.mxu0 %v5612_v1  ;;  %4406 = vmatpush1.bf16.msra.mxu0 %v5714_v29  ;;  %v47_v5 = vld [vmem:[%s6672_s0 + $0x28] sm:$0xff]  ;;  %v5777_v7 = vpack.c.bf16 %v530_v63, %v527_v62  ;;  %v529_v9 = vld [vmem:[#allocation4 + $0x138] sm:$0xff]  ;;  %v536_v11 = vld [vmem:[#allocation4 + $0x170] sm:$0xff]  ;;  %v5783_v12 = vpack.c.bf16 %v501_v4, %v498_v3  ;;  %v73_v56 = vshrl.u32 %v72_v55, 7 }
  0x26   :  { %4408 = vmatprep.subr.bf16.mxu0 %v5717_v30  ;;  %v526_v8 = vld [vmem:[#allocation4 + $0x120] sm:$0xff]  ;;  %v533_v10 = vld [vmem:[#allocation4 + $0x158] sm:$0xff]  ;;  %v504_v13 = vld [vmem:[#allocation4 + $0x70] sm:$0xff] }
  0x27   :  { %4398 = vmatpush3.bf16.msra.mxu1 %v4395_v47  ;;  %v507_v14 = vld [vmem:[#allocation4 + $0x88] sm:$0xff]  ;;  %v5792_v16 = vpack.c.bf16 %v529_v9, %v526_v8  ;;  %v5795_v18 = vpack.c.bf16 %v536_v11, %v533_v10  ;;  %v532_v19 = vld [vmem:[#allocation4 + $0x150] sm:$0xff]  ;;  %v510_v24 = vld [vmem:[#allocation4 + $0xa0] sm:$0xff]  ;;  %v74_v55 = vsub.s32 0, %v73_v56 }
  0x28   :  { %3383 = vmatmul.mubr.msk.f32.gmra.mrb[4].mxu0 %vm87_vm0, %v44_v35  ;;  %4431 = vmatprep.subr.bf16.mxu1 %v5613_v0  ;;  %v48_v15 = vld [vmem:[%s6672_s0 + $0x30] sm:$0xff]  ;;  %v5800_v21 = vpack.c.bf16 %v507_v14, %v504_v13  ;;  %v513_v25 = vld [vmem:[#allocation4 + $0xb8] sm:$0xff]  ;;  %v51_v38 = vld [vmem:[%s6672_s0 + $0x48] sm:$0xff] }
  0x29   :  { %218 = vmatprep.mubr.f32.mxu0 %v5612_v1  ;;  %4410 = vmatpush1.bf16.msra.mxu0 %v5726_v36  ;;  %v535_v20 = vld [vmem:[#allocation4 + $0x168] sm:$0xff]  ;;  %v49_v26 = vld [vmem:[%s6672_s0 + $0x38] sm:$0xff]  ;;  %v50_v33 = vld [vmem:[%s6672_s0 + $0x40] sm:$0xff] }
  0x2a   :  { %4412 = vmatprep.subr.bf16.mxu0 %v5735_v40  ;;  %3765 = vmatmul.mubr.msk.f32.vlgmr.msra.gmra.mrb[0].mxu1 %vm87_vm0, %v5712_v28  ;;  %v5809_v27 = vpack.c.bf16 %v535_v20, %v532_v19  ;;  %v5815_v28 = vpack.c.bf16 %v513_v25, %v510_v24  ;;  %v516_v31 = vld [vmem:[#allocation4 + $0xd0] sm:$0xff]  ;;  %v519_v32 = vld [vmem:[#allocation4 + $0xe8] sm:$0xff]  ;;  %v525_v37 = vld [vmem:[#allocation4 + $0x118] sm:$0xff] }
  0x2b   :  { %4433 = vmatpush3.bf16.msra.mxu1 %v5766_v2  ;;  %3767 = vmatprep.mubr.msk.f32.mxu1 %vm87_vm0, %v44_v35  ;;  %v5828_v34 = vpack.c.bf16 %v519_v32, %v516_v31  ;;  %v522_v35 = vld [vmem:[#allocation4 + $0x100] sm:$0xff]  ;;  %v52_v39 = vld [vmem:[%s6672_s0 + $0x50] sm:$0xff]  ;;  %v53_v44 = vld [vmem:[%s6672_s0 + $0x58] sm:$0xff] }
  0x2c   :  { %3384 = vmatmul.mubr.msk.f32.gmra.mrb[6].mxu0 %vm87_vm0, %v45_v48  ;;  %4434 = vmatprep.subr.bf16.mxu1 %v5613_v0  ;;  %v5842_v41 = vpack.c.bf16 %v525_v37, %v522_v35  ;;  %v528_v42 = vld [vmem:[#allocation4 + $0x130] sm:$0xff]  ;;  %v531_v43 = vld [vmem:[#allocation4 + $0x148] sm:$0xff]  ;;  %v54_v45 = vld [vmem:[%s6672_s0 + $0x60] sm:$0xff] }
  0x2d   :  { %224 = vmatprep.mubr.f32.mxu0 %v5612_v1  ;;  %4414 = vmatpush1.bf16.msra.mxu0 %v5749_v49  ;;  %v5856_v46 = vpack.c.bf16 %v531_v43, %v528_v42  ;;  %v534_v47 = vld [vmem:[#allocation4 + $0x160] sm:$0xff]  ;;  %v56_v52 = vld [vmem:[%s6672_s0 + $0x70] sm:$0xff]  ;;  %v57_v54 = vld [vmem:[%s6672_s0 + $0x78] sm:$0xff] }
  0x2e   :  { %4416 = vmatprep.subr.bf16.mxu0 %v5752_v50  ;;  %3768 = vmatmul.mubr.msk.f32.gmra.mrb[2].mxu1 %vm87_vm0, %v45_v48  ;;  %v537_v48 = vld [vmem:[#allocation4 + $0x178] sm:$0xff]  ;;  %v55_v51 = vld [vmem:[%s6672_s0 + $0x68] sm:$0xff] }
  0x2f   :  { %4436 = vmatpush3.bf16.msra.mxu1 %v5783_v12  ;;  %3770 = vmatprep.mubr.msk.f32.mxu1 %vm87_vm0, %v46_v57  ;;  %v5870_v53 = vpack.c.bf16 %v537_v48, %v534_v47  ;;  %v70_v60 = vld [vmem:[%s6674_s2] sm:$0x7] }
  0x30   :  { %3385 = vmatmul.mubr.msk.f32.gmra.mrb[8].mxu0 %vm87_vm0, %v46_v57  ;;  %4437 = vmatprep.subr.bf16.mxu1 %v5613_v0  ;;  %v82_v57 = vsub.s32 2, %v73_v56 }
  0x31   :  { %230 = vmatprep.mubr.f32.mxu0 %v5612_v1  ;;  %4418 = vmatpush1.bf16.msra.mxu0 %v5760_v58 }
  0x32   :  { %4420 = vmatprep.subr.bf16.mxu0 %v5763_v59  ;;  %3771 = vmatmul.mubr.msk.f32.gmra.mrb[4].mxu1 %vm87_vm0, %v47_v5  ;;  %v83_v61 = vrot.slane %v70_v60, %v82_v57 }
  0x33   :  { %4439 = vmatpush3.bf16.msra.mxu1 %v5800_v21  ;;  %3773 = vmatprep.mubr.msk.f32.mxu1 %vm87_vm0, %v48_v15 }
  0x34   :  { %3386 = vmatmul.mubr.msk.f32.gmra.mrb[10].mxu0 %vm87_vm0, %v47_v5  ;;  %4440 = vmatprep.subr.bf16.mxu1 %v5613_v0 }
  0x35   :  { %236 = vmatprep.mubr.f32.mxu0 %v5612_v1  ;;  %4422 = vmatpush1.bf16.msra.mxu0 %v5774_v6 }
  0x36   :  { %4424 = vmatprep.subr.bf16.mxu0 %v5777_v7  ;;  %3774 = vmatmul.mubr.msk.f32.gmra.mrb[6].mxu1 %vm87_vm0, %v49_v26 }
  0x37   :  { %4442 = vmatpush3.bf16.msra.mxu1 %v5815_v28  ;;  %3776 = vmatprep.mubr.msk.f32.mxu1 %vm87_vm0, %v50_v33 }
  0x38   :  { %3387 = vmatmul.mubr.msk.f32.gmra.mrb[12].mxu0 %vm87_vm0, %v48_v15  ;;  %4443 = vmatprep.subr.bf16.mxu1 %v5613_v0 }
  0x39   :  { %242 = vmatprep.mubr.f32.mxu0 %v5612_v1  ;;  %4426 = vmatpush1.bf16.msra.mxu0 %v5792_v16 }
  0x3a   :  { %4428 = vmatprep.subr.bf16.mxu0 %v5795_v18  ;;  %3777 = vmatmul.mubr.msk.f32.gmra.mrb[8].mxu1 %vm87_vm0, %v51_v38 }
  0x3b   :  { %4445 = vmatpush3.bf16.msra.mxu1 %v5828_v34  ;;  %3779 = vmatprep.mubr.msk.f32.mxu1 %vm87_vm0, %v52_v39 }
  0x3c   :  { %3388 = vmatmul.mubr.msk.f32.gmra.mrb[14].mxu0 %vm87_vm0, %v49_v26  ;;  %4446 = vmatprep.subr.bf16.mxu1 %v5613_v0 }
  0x3d   :  { %248 = vmatprep.mubr.f32.mxu0 %v5612_v1  ;;  %4430 = vmatpush1.bf16.msra.mxu0 %v5809_v27 }
  0x3e   :  { %4456 = vmatprep.subr.bf16.mxu0 %v5699_v17  ;;  %3780 = vmatmul.mubr.msk.f32.gmra.mrb[10].mxu1 %vm87_vm0, %v53_v44 }
  0x3f   :  { %4448 = vmatpush3.bf16.msra.mxu1 %v5842_v41  ;;  %3782 = vmatprep.mubr.msk.f32.mxu1 %vm87_vm0, %v54_v45 }
  0x40   :  { %3389 = vmatmul.mubr.msk.f32.gmra.mrb[16].mxu0 %vm87_vm0, %v50_v33  ;;  %4449 = vmatprep.subr.bf16.mxu1 %v5613_v0 }
  0x41   :  { %254 = vmatprep.mubr.f32.mxu0 %v5612_v1 }
  0x42   :  { %3783 = vmatmul.mubr.msk.f32.gmra.mrb[12].mxu1 %vm87_vm0, %v55_v51 }
  0x43   :  { %4451 = vmatpush3.bf16.msra.mxu1 %v5856_v46  ;;  %3785 = vmatprep.mubr.msk.f32.mxu1 %vm87_vm0, %v56_v52 }
  0x44   :  { %3390 = vmatmul.mubr.msk.f32.gmra.mrb[18].mxu0 %vm87_vm0, %v51_v38  ;;  %4452 = vmatprep.subr.bf16.mxu1 %v5613_v0 }
  0x45   :  { %260 = vmatprep.mubr.f32.mxu0 %v5612_v1 }
  0x46   :  { %3786 = vmatmul.mubr.msk.f32.gmra.mrb[14].mxu1 %vm87_vm0, %v57_v54 }
  0x47   :  { %4454 = vmatpush3.bf16.msra.mxu1 %v5870_v53  ;;  %3820 = vmatprep.mubr.msk.f32.mxu1 %vm5614_vm1, %v5612_v1 }
  0x48   :  { %3391 = vmatmul.mubr.msk.f32.gmra.mrb[20].mxu0 %vm87_vm0, %v52_v39  ;;  %4487 = vmatprep.subr.bf16.mxu1 %v5613_v0 }
  0x49   :  { %266 = vmatprep.mubr.f32.mxu0 %v5612_v1 }
  0x4a   :  { %3821 = vmatmul.mubr.f32.vlgmr.msra.gmra.mrb[16].mxu1 %v5612_v1 }
  0x4b   :  { %4489 = vmatpush3.bf16.msra.mxu1 %v5766_v2  ;;  %3855 = vmatprep.mubr.msk.f32.mxu1 %vm5614_vm1, %v5612_v1 }
  0x4c   :  { %3392 = vmatmul.mubr.msk.f32.gmra.mrb[22].mxu0 %vm87_vm0, %v53_v44  ;;  %4490 = vmatprep.subr.bf16.mxu1 %v5613_v0 }
  0x4d   :  { %272 = vmatprep.mubr.f32.mxu0 %v5612_v1 }
  0x4f   :  { %4492 = vmatpush3.bf16.msra.mxu1 %v5783_v12 }
  0x50   :  { %3393 = vmatmul.mubr.msk.f32.gmra.mrb[24].mxu0 %vm87_vm0, %v54_v45  ;;  %4493 = vmatprep.subr.bf16.mxu1 %v5613_v0 }
  0x51   :  { %278 = vmatprep.mubr.f32.mxu0 %v5612_v1 }
  0x53   :  { %4495 = vmatpush3.bf16.msra.mxu1 %v5800_v21 }
  0x54   :  { %3394 = vmatmul.mubr.msk.f32.gmra.mrb[26].mxu0 %vm87_vm0, %v55_v51  ;;  %4496 = vmatprep.subr.bf16.mxu1 %v5613_v0 }
  0x55   :  { %284 = vmatprep.mubr.f32.mxu0 %v5612_v1 }
  0x57   :  { %4498 = vmatpush3.bf16.msra.mxu1 %v5815_v28 }
  0x58   :  { %3395 = vmatmul.mubr.msk.f32.gmra.mrb[28].mxu0 %vm87_vm0, %v56_v52  ;;  %4499 = vmatprep.subr.bf16.mxu1 %v5613_v0 }
  0x59   :  { %290 = vmatprep.mubr.f32.mxu0 %v5612_v1 }
  0x5b   :  { %4501 = vmatpush3.bf16.msra.mxu1 %v5828_v34 }
  0x5c   :  { %3396 = vmatmul.mubr.msk.f32.gmra.mrb[30].mxu0 %vm87_vm0, %v57_v54  ;;  %4502 = vmatprep.subr.bf16.mxu1 %v5613_v0 }
  0x5d   :  { %625 = vmatprep.mubr.f32.mxu0 %v5612_v1 }
  0x5f   :  { %4504 = vmatpush3.bf16.msra.mxu1 %v5842_v41 }
  0x60   :  { %626 = vmatmul.mubr.f32.vlgmr.msra.gmra.mrb[0].mxu0 %v5612_v1  ;;  %4505 = vmatprep.subr.bf16.mxu1 %v5613_v0 }
  0x61   :  { %4458 = vmatpush1.bf16.msra.mxu0 %v5701_v22  ;;  %794 = vmatprep.mubr.f32.mxu0 %v5612_v1 }
  0x62   :  { %4460 = vmatprep.subr.bf16.mxu0 %v5704_v23 }
  0x63   :  { %4507 = vmatpush3.bf16.msra.mxu1 %v5856_v46 }
  0x64   :  { %4508 = vmatprep.subr.bf16.mxu1 %v5613_v0 }
  0x65   :  { %4462 = vmatpush1.bf16.msra.mxu0 %v5714_v29 }
  0x66   :  { %4464 = vmatprep.subr.bf16.mxu0 %v5717_v30 }
  0x67   :  { %4510 = vmatpush3.bf16.msra.mxu1 %v5870_v53 }
  0x68   :  { %4543 = vmatprep.subr.bf16.mxu1 %v5613_v0 }
  0x69   :  { %4466 = vmatpush1.bf16.msra.mxu0 %v5726_v36 }
  0x6a   :  { %4468 = vmatprep.subr.bf16.mxu0 %v5735_v40 }
  0x6d   :  { %4470 = vmatpush1.bf16.msra.mxu0 %v5749_v49 }
  0x6e   :  { %4472 = vmatprep.subr.bf16.mxu0 %v5752_v50 }
  0x71   :  { %4474 = vmatpush1.bf16.msra.mxu0 %v5760_v58 }
  0x72   :  { %4476 = vmatprep.subr.bf16.mxu0 %v5763_v59 }
  0x75   :  { %4478 = vmatpush1.bf16.msra.mxu0 %v5774_v6 }
  0x76   :  { %4480 = vmatprep.subr.bf16.mxu0 %v5777_v7 }
  0x79   :  { %4482 = vmatpush1.bf16.msra.mxu0 %v5792_v16 }
  0x7a   :  { %4484 = vmatprep.subr.bf16.mxu0 %v5795_v18 }
  0x7d   :  { %4486 = vmatpush1.bf16.msra.mxu0 %v5809_v27 }
  0x7e   :  { %4512 = vmatprep.subr.bf16.mxu0 %v5699_v17 }
  0xfd   :  { %v3766_v62 = vpop.f32.mrb[0].mxu1 }
  0xfe   :  { %v5931_v63 = vadd.f32 %v3766_v62, %v83_v61  ;;  %v363_v3 = vpop.f32.mrb[1].mxu1  ;;  %v538_v62 = vld [vmem:[%s6676_s4] sm:$0x7] }
 0x101   :  { %v3769_v4 = vpop.f32.mrb[2].mxu1 }
 0x102   :  { %v5933_v5 = vadd.f32 %v3769_v4, %v83_v61  ;;  %v373_v8 = vpop.f32.mrb[3].mxu1  ;;  %v78_v4 = vsub.s32 1, %v73_v56 }
 0x103   :  { %v5935_v9 = vadd.f32 %v373_v8, %v83_v61  ;;  %v75_v8 = vrot.slane %v70_v60, %v74_v55 }
 0x105   :  { %v3772_v10 = vpop.f32.mrb[4].mxu1 }
 0x106   :  { %v5937_v11 = vadd.f32 %v3772_v10, %v83_v61  ;;  %v383_v13 = vpop.f32.mrb[5].mxu1  ;;  %v549_v10 = vrot.slane %v538_v62, %v74_v55 }
 0x107   :  { %v5939_v14 = vadd.f32 %v383_v13, %v83_v61  ;;  %v79_v13 = vrot.slane %v70_v60, %v78_v4 }
 0x109   :  { %v3775_v15 = vpop.f32.mrb[6].mxu1 }
 0x10a   :  { %v5941_v19 = vadd.f32 %v3775_v15, %v83_v61  ;;  %v393_v20 = vpop.f32.mrb[7].mxu1  ;;  %v553_v15 = vrot.slane %v538_v62, %v78_v4 }
 0x10b   :  { %v5943_v24 = vadd.f32 %v393_v20, %v83_v61  ;;  %v5964_v20 = vadd.f32 %v549_v10, %v75_v8  ;;  %v364_v10 = vadd.f32 %v363_v3, %v83_v61 }
 0x10d   :  { %v3778_v25 = vpop.f32.mrb[8].mxu1 }
 0x10e   :  { %v5945_v26 = vadd.f32 %v3778_v25, %v83_v61  ;;  %v403_v31 = vpop.f32.mrb[9].mxu1 }
 0x10f   :  { %v5947_v32 = vadd.f32 %v403_v31, %v83_v61  ;;  %v5966_v31 = vadd.f32 %v553_v15, %v79_v13 }
 0x111   :  { %v3781_v33 = vpop.f32.mrb[10].mxu1 }
 0x112   :  { %v5949_v35 = vadd.f32 %v3781_v33, %v83_v61  ;;  %v413_v37 = vpop.f32.mrb[11].mxu1 }
 0x113   :  { %v5951_v38 = vadd.f32 %v413_v37, %v83_v61 }
 0x115   :  { %v3784_v39 = vpop.f32.mrb[12].mxu1 }
 0x116   :  { %v5953_v42 = vadd.f32 %v3784_v39, %v83_v61  ;;  %v423_v43 = vpop.f32.mrb[13].mxu1 }
 0x117   :  { %v5955_v44 = vadd.f32 %v423_v43, %v83_v61 }
 0x119   :  { %v3787_v45 = vpop.f32.mrb[14].mxu1 }
 0x11a   :  { %v5957_v47 = vadd.f32 %v3787_v45, %v83_v61  ;;  %v433_v48 = vpop.f32.mrb[15].mxu1 }
 0x11b   :  { %v5959_v51 = vadd.f32 %v433_v48, %v83_v61 }
 0x11d   :  { %v698_v52 = vpop.f32.mrb[16].mxu1 }
 0x11e   :  { %v3822_v54 = vpop.f32.mrb[17].mxu1 }
 0x11f   :  { %v5970_v54 = vrot.slane %v538_v62, %v82_v57 }
 0x121   :  { %v699_v4 = vadd.f32 %v698_v52, %v5970_v54 }
 0x133   :  { %v627_v25 = vpop.f32.mrb[0].mxu0 }
 0x134   :  { %v5320_v33 = vadd.f32 %v5964_v20, %v627_v25  ;;  %v629_v37 = vpop.f32.mrb[1].mxu0 }
 0x135   :  { %v5322_v43 = vadd.f32 %v5966_v31, %v629_v37 }
 0x136   :  { %v3413_v39 = vmul.f32 -1.442695, %v5320_v33 }
 0x137   :  { %v3414_v45 = vmul.f32 -1.442695, %v5322_v43 }
 0x138   :  { %5421 = vpow2.f32 %v3413_v39 }
 0x139   :  { %5423 = vpow2.f32 %v3414_v45 }
 0x142   :  { %v5422_v48 = vpop.eup %5421 }
 0x143   :  { %v706_v56 = vadd.f32 1.0, %v5422_v48  ;;  %v5424_v60 = vpop.eup %5423 }
 0x144   :  { %v713_v55 = vadd.f32 1.0, %v5424_v60 }
 0x145   :  { %5425 = vrcp.f32 %v706_v56 }
 0x146   :  { %5427 = vrcp.f32 %v713_v55 }
 0x14f   :  { %v5426_v8 = vpop.eup %5425 }
 0x150   :  { %v716_v13 = vmul.f32 %v5426_v8, %v699_v4  ;;  %v5428_v25 = vpop.eup %5427 }
 0x151   :  { %v719_v33 = vsub.f32 1.0, %v5428_v25  ;;  %v721_v43 = vmul.f32 0.0, %v5428_v25 }
 0x152   :  { %v717_v15 = vadd.f32 %v716_v13, %v364_v10 }
 0x154   :  { %5429 = vtanh.f32 %v717_v15 }
 0x15e   :  { %v5430_v37 = vpop.eup %5429 }
 0x15f   :  { %v720_v39 = vmul.f32 %v5430_v37, %v719_v33 }
 0x161   :  { %v5973_v45 = vadd.f32 %v721_v43, %v720_v39 }
 0x163   :  { %795 = vmatmul.mubr.f32.vlgmr.msra.gmra.mrb[2].mxu0 %v5973_v45  ;;  %3856 = vmatmul.mubr.f32.vlgmr.msra.gmra.mrb[18].mxu1 %v5973_v45 }
 0x164   :  { %4514 = vmatpush1.bf16.msra.mxu0 %v5701_v22  ;;  %4545 = vmatpush3.bf16.msra.mxu1 %v5766_v2 }
 0x165   :  { %4516 = vmatprep.subr.bf16.mxu0 %v5704_v23  ;;  %4546 = vmatprep.subr.bf16.mxu1 %v5613_v0 }
 0x166   :  { %963 = vmatprep.mubr.f32.mxu0 %v5612_v1  ;;  %3890 = vmatprep.mubr.msk.f32.mxu1 %vm5614_vm1, %v5612_v1 }
 0x168   :  { %4518 = vmatpush1.bf16.msra.mxu0 %v5714_v29  ;;  %4548 = vmatpush3.bf16.msra.mxu1 %v5783_v12 }
 0x169   :  { %4520 = vmatprep.subr.bf16.mxu0 %v5717_v30  ;;  %4549 = vmatprep.subr.bf16.mxu1 %v5613_v0 }
 0x16c   :  { %4522 = vmatpush1.bf16.msra.mxu0 %v5726_v36  ;;  %4551 = vmatpush3.bf16.msra.mxu1 %v5800_v21 }
 0x16d   :  { %4524 = vmatprep.subr.bf16.mxu0 %v5735_v40  ;;  %4552 = vmatprep.subr.bf16.mxu1 %v5613_v0 }
 0x170   :  { %4526 = vmatpush1.bf16.msra.mxu0 %v5749_v49  ;;  %4554 = vmatpush3.bf16.msra.mxu1 %v5815_v28 }
 0x171   :  { %4528 = vmatprep.subr.bf16.mxu0 %v5752_v50  ;;  %4555 = vmatprep.subr.bf16.mxu1 %v5613_v0 }
 0x174   :  { %4530 = vmatpush1.bf16.msra.mxu0 %v5760_v58  ;;  %4557 = vmatpush3.bf16.msra.mxu1 %v5828_v34 }
 0x175   :  { %4532 = vmatprep.subr.bf16.mxu0 %v5763_v59  ;;  %4558 = vmatprep.subr.bf16.mxu1 %v5613_v0 }
 0x178   :  { %4534 = vmatpush1.bf16.msra.mxu0 %v5774_v6  ;;  %4560 = vmatpush3.bf16.msra.mxu1 %v5842_v41 }
 0x179   :  { %4536 = vmatprep.subr.bf16.mxu0 %v5777_v7  ;;  %4561 = vmatprep.subr.bf16.mxu1 %v5613_v0 }
 0x17c   :  { %4538 = vmatpush1.bf16.msra.mxu0 %v5792_v16  ;;  %4563 = vmatpush3.bf16.msra.mxu1 %v5856_v46 }
 0x17d   :  { %4540 = vmatprep.subr.bf16.mxu0 %v5795_v18  ;;  %4564 = vmatprep.subr.bf16.mxu1 %v5613_v0 }
 0x180   :  { %4542 = vmatpush1.bf16.msra.mxu0 %v5809_v27  ;;  %4566 = vmatpush3.bf16.msra.mxu1 %v5870_v53 }
 0x181   :  { %4568 = vmatprep.subr.bf16.mxu0 %v5699_v17  ;;  %4599 = vmatprep.subr.bf16.mxu1 %v5613_v0 }
 0x236   :  { %v796_v57 = vpop.f32.mrb[2].mxu0  ;;  %v867_v61 = vpop.f32.mrb[18].mxu1 }
 0x237   :  { %v5324_v3 = vadd.f32 %v5964_v20, %v796_v57  ;;  %v798_v52 = vpop.f32.mrb[3].mxu0  ;;  %v3857_v62 = vpop.f32.mrb[19].mxu1  ;;  %v868_v13 = vadd.f32 %v867_v61, %v5970_v54 }
 0x238   :  { %v5326_v56 = vadd.f32 %v5966_v31, %v798_v52 }
 0x239   :  { %v3415_v48 = vmul.f32 -1.442695, %v5324_v3 }
 0x23a   :  { %v3416_v60 = vmul.f32 -1.442695, %v5326_v56 }
 0x23b   :  { %5431 = vpow2.f32 %v3415_v48 }
 0x23c   :  { %5433 = vpow2.f32 %v3416_v60 }
 0x245   :  { %v5432_v55 = vpop.eup %5431 }
 0x246   :  { %v875_v4 = vadd.f32 1.0, %v5432_v55  ;;  %v5434_v8 = vpop.eup %5433 }
 0x247   :  { %v882_v10 = vadd.f32 1.0, %v5434_v8 }
 0x248   :  { %5435 = vrcp.f32 %v875_v4 }
 0x249   :  { %5437 = vrcp.f32 %v882_v10 }
 0x252   :  { %v5436_v15 = vpop.eup %5435 }
 0x253   :  { %v885_v25 = vmul.f32 %v5436_v15, %v868_v13  ;;  %v5438_v37 = vpop.eup %5437 }
 0x254   :  { %v888_v39 = vsub.f32 1.0, %v5438_v37  ;;  %v890_v3 = vmul.f32 %v5438_v37, %v5973_v45 }
 0x255   :  { %v886_v33 = vadd.f32 %v885_v25, %v5931_v63 }
 0x257   :  { %5439 = vtanh.f32 %v886_v33 }
 0x261   :  { %v5440_v43 = vpop.eup %5439 }
 0x262   :  { %v889_v57 = vmul.f32 %v5440_v43, %v888_v39 }
 0x264   :  { %v6017_v52 = vadd.f32 %v890_v3, %v889_v57 }
 0x266   :  { %964 = vmatmul.mubr.f32.vlgmr.msra.gmra.mrb[4].mxu0 %v6017_v52  ;;  %3891 = vmatmul.mubr.f32.vlgmr.msra.gmra.mrb[20].mxu1 %v6017_v52 }
 0x267   :  { %4570 = vmatpush1.bf16.msra.mxu0 %v5701_v22  ;;  %4601 = vmatpush3.bf16.msra.mxu1 %v5766_v2 }
 0x268   :  { %4572 = vmatprep.subr.bf16.mxu0 %v5704_v23  ;;  %4602 = vmatprep.subr.bf16.mxu1 %v5613_v0 }
 0x269   :  { %1132 = vmatprep.mubr.f32.mxu0 %v5612_v1  ;;  %3925 = vmatprep.mubr.msk.f32.mxu1 %vm5614_vm1, %v5612_v1 }
 0x26b   :  { %4574 = vmatpush1.bf16.msra.mxu0 %v5714_v29  ;;  %4604 = vmatpush3.bf16.msra.mxu1 %v5783_v12 }
 0x26c   :  { %4576 = vmatprep.subr.bf16.mxu0 %v5717_v30  ;;  %4605 = vmatprep.subr.bf16.mxu1 %v5613_v0 }
 0x26f   :  { %4578 = vmatpush1.bf16.msra.mxu0 %v5726_v36  ;;  %4607 = vmatpush3.bf16.msra.mxu1 %v5800_v21 }
 0x270   :  { %4580 = vmatprep.subr.bf16.mxu0 %v5735_v40  ;;  %4608 = vmatprep.subr.bf16.mxu1 %v5613_v0 }
 0x273   :  { %4582 = vmatpush1.bf16.msra.mxu0 %v5749_v49  ;;  %4610 = vmatpush3.bf16.msra.mxu1 %v5815_v28 }
 0x274   :  { %4584 = vmatprep.subr.bf16.mxu0 %v5752_v50  ;;  %4611 = vmatprep.subr.bf16.mxu1 %v5613_v0 }
 0x277   :  { %4586 = vmatpush1.bf16.msra.mxu0 %v5760_v58  ;;  %4613 = vmatpush3.bf16.msra.mxu1 %v5828_v34 }
 0x278   :  { %4588 = vmatprep.subr.bf16.mxu0 %v5763_v59  ;;  %4614 = vmatprep.subr.bf16.mxu1 %v5613_v0 }
 0x27b   :  { %4590 = vmatpush1.bf16.msra.mxu0 %v5774_v6  ;;  %4616 = vmatpush3.bf16.msra.mxu1 %v5842_v41 }
 0x27c   :  { %4592 = vmatprep.subr.bf16.mxu0 %v5777_v7  ;;  %4617 = vmatprep.subr.bf16.mxu1 %v5613_v0 }
 0x27f   :  { %4594 = vmatpush1.bf16.msra.mxu0 %v5792_v16  ;;  %4619 = vmatpush3.bf16.msra.mxu1 %v5856_v46 }
 0x280   :  { %4596 = vmatprep.subr.bf16.mxu0 %v5795_v18  ;;  %4620 = vmatprep.subr.bf16.mxu1 %v5613_v0 }
 0x283   :  { %4598 = vmatpush1.bf16.msra.mxu0 %v5809_v27  ;;  %4622 = vmatpush3.bf16.msra.mxu1 %v5870_v53 }
 0x284   :  { %4624 = vmatprep.subr.bf16.mxu0 %v5699_v17  ;;  %4655 = vmatprep.subr.bf16.mxu1 %v5613_v0 }
 0x339   :  { %v965_v63 = vpop.f32.mrb[4].mxu0  ;;  %v1036_v61 = vpop.f32.mrb[20].mxu1 }
 0x33a   :  { %v5328_v62 = vadd.f32 %v5964_v20, %v965_v63  ;;  %v967_v48 = vpop.f32.mrb[5].mxu0  ;;  %v3892_v56 = vpop.f32.mrb[21].mxu1  ;;  %v1037_v25 = vadd.f32 %v1036_v61, %v5970_v54 }
 0x33b   :  { %v5330_v55 = vadd.f32 %v5966_v31, %v967_v48 }
 0x33c   :  { %v3417_v60 = vmul.f32 -1.442695, %v5328_v62 }
 0x33d   :  { %v3418_v4 = vmul.f32 -1.442695, %v5330_v55 }
 0x33e   :  { %5441 = vpow2.f32 %v3417_v60 }
 0x33f   :  { %5443 = vpow2.f32 %v3418_v4 }
 0x348   :  { %v5442_v8 = vpop.eup %5441 }
 0x349   :  { %v1044_v10 = vadd.f32 1.0, %v5442_v8  ;;  %v5444_v13 = vpop.eup %5443 }
 0x34a   :  { %v1051_v15 = vadd.f32 1.0, %v5444_v13 }
 0x34b   :  { %5445 = vrcp.f32 %v1044_v10 }
 0x34c   :  { %5447 = vrcp.f32 %v1051_v15 }
 0x355   :  { %v5446_v33 = vpop.eup %5445 }
 0x356   :  { %v1054_v37 = vmul.f32 %v5446_v33, %v1037_v25  ;;  %v5448_v43 = vpop.eup %5447 }
 0x357   :  { %v1057_v57 = vsub.f32 1.0, %v5448_v43  ;;  %v1059_v62 = vmul.f32 %v5448_v43, %v6017_v52 }
 0x358   :  { %v1055_v39 = vadd.f32 %v1054_v37, %v5935_v9 }
 0x35a   :  { %5449 = vtanh.f32 %v1055_v39 }
 0x364   :  { %v5450_v3 = vpop.eup %5449 }
 0x365   :  { %v1058_v63 = vmul.f32 %v5450_v3, %v1057_v57 }
 0x367   :  { %v6061_v48 = vadd.f32 %v1059_v62, %v1058_v63 }
 0x369   :  { %1133 = vmatmul.mubr.f32.vlgmr.msra.gmra.mrb[6].mxu0 %v6061_v48  ;;  %3926 = vmatmul.mubr.f32.vlgmr.msra.gmra.mrb[22].mxu1 %v6061_v48 }
 0x36a   :  { %4626 = vmatpush1.bf16.msra.mxu0 %v5701_v22  ;;  %4657 = vmatpush3.bf16.msra.mxu1 %v5766_v2 }
 0x36b   :  { %4628 = vmatprep.subr.bf16.mxu0 %v5704_v23  ;;  %4658 = vmatprep.subr.bf16.mxu1 %v5613_v0 }
 0x36c   :  { %1301 = vmatprep.mubr.f32.mxu0 %v5612_v1  ;;  %3960 = vmatprep.mubr.msk.f32.mxu1 %vm5614_vm1, %v5612_v1 }
 0x36e   :  { %4630 = vmatpush1.bf16.msra.mxu0 %v5714_v29  ;;  %4660 = vmatpush3.bf16.msra.mxu1 %v5783_v12 }
 0x36f   :  { %4632 = vmatprep.subr.bf16.mxu0 %v5717_v30  ;;  %4661 = vmatprep.subr.bf16.mxu1 %v5613_v0 }
 0x372   :  { %4634 = vmatpush1.bf16.msra.mxu0 %v5726_v36  ;;  %4663 = vmatpush3.bf16.msra.mxu1 %v5800_v21 }
 0x373   :  { %4636 = vmatprep.subr.bf16.mxu0 %v5735_v40  ;;  %4664 = vmatprep.subr.bf16.mxu1 %v5613_v0 }
 0x376   :  { %4638 = vmatpush1.bf16.msra.mxu0 %v5749_v49  ;;  %4666 = vmatpush3.bf16.msra.mxu1 %v5815_v28 }
 0x377   :  { %4640 = vmatprep.subr.bf16.mxu0 %v5752_v50  ;;  %4667 = vmatprep.subr.bf16.mxu1 %v5613_v0 }
 0x37a   :  { %4642 = vmatpush1.bf16.msra.mxu0 %v5760_v58  ;;  %4669 = vmatpush3.bf16.msra.mxu1 %v5828_v34 }
 0x37b   :  { %4644 = vmatprep.subr.bf16.mxu0 %v5763_v59  ;;  %4670 = vmatprep.subr.bf16.mxu1 %v5613_v0 }
 0x37e   :  { %4646 = vmatpush1.bf16.msra.mxu0 %v5774_v6  ;;  %4672 = vmatpush3.bf16.msra.mxu1 %v5842_v41 }
 0x37f   :  { %4648 = vmatprep.subr.bf16.mxu0 %v5777_v7  ;;  %4673 = vmatprep.subr.bf16.mxu1 %v5613_v0 }
 0x382   :  { %4650 = vmatpush1.bf16.msra.mxu0 %v5792_v16  ;;  %4675 = vmatpush3.bf16.msra.mxu1 %v5856_v46 }
 0x383   :  { %4652 = vmatprep.subr.bf16.mxu0 %v5795_v18  ;;  %4676 = vmatprep.subr.bf16.mxu1 %v5613_v0 }
 0x386   :  { %4654 = vmatpush1.bf16.msra.mxu0 %v5809_v27  ;;  %4678 = vmatpush3.bf16.msra.mxu1 %v5870_v53 }
 0x387   :  { %4680 = vmatprep.subr.bf16.mxu0 %v5699_v17  ;;  %4711 = vmatprep.subr.bf16.mxu1 %v5613_v0 }
 0x43c   :  { %v1134_v9 = vpop.f32.mrb[6].mxu0  ;;  %v1205_v61 = vpop.f32.mrb[22].mxu1 }
 0x43d   :  { %v5332_v56 = vadd.f32 %v5964_v20, %v1134_v9  ;;  %v1136_v60 = vpop.f32.mrb[7].mxu0  ;;  %v3927_v55 = vpop.f32.mrb[23].mxu1  ;;  %v1206_v37 = vadd.f32 %v1205_v61, %v5970_v54 }
 0x43e   :  { %v5334_v8 = vadd.f32 %v5966_v31, %v1136_v60 }
 0x43f   :  { %v3419_v4 = vmul.f32 -1.442695, %v5332_v56 }
 0x440   :  { %v3420_v10 = vmul.f32 -1.442695, %v5334_v8 }
 0x441   :  { %5451 = vpow2.f32 %v3419_v4 }
 0x442   :  { %5453 = vpow2.f32 %v3420_v10 }
 0x44b   :  { %v5452_v13 = vpop.eup %5451 }
 0x44c   :  { %v1213_v15 = vadd.f32 1.0, %v5452_v13  ;;  %v5454_v25 = vpop.eup %5453 }
 0x44d   :  { %v1220_v33 = vadd.f32 1.0, %v5454_v25 }
 0x44e   :  { %5455 = vrcp.f32 %v1213_v15 }
 0x44f   :  { %5457 = vrcp.f32 %v1220_v33 }
 0x458   :  { %v5456_v39 = vpop.eup %5455 }
 0x459   :  { %v1223_v43 = vmul.f32 %v5456_v39, %v1206_v37  ;;  %v5458_v3 = vpop.eup %5457 }
 0x45a   :  { %v1226_v63 = vsub.f32 1.0, %v5458_v3  ;;  %v1228_v56 = vmul.f32 %v5458_v3, %v6061_v48 }
 0x45b   :  { %v1224_v57 = vadd.f32 %v1223_v43, %v5933_v5 }
 0x45d   :  { %5459 = vtanh.f32 %v1224_v57 }
 0x467   :  { %v5460_v62 = vpop.eup %5459 }
 0x468   :  { %v1227_v9 = vmul.f32 %v5460_v62, %v1226_v63 }
 0x46a   :  { %v6105_v60 = vadd.f32 %v1228_v56, %v1227_v9 }
 0x46c   :  { %1302 = vmatmul.mubr.f32.vlgmr.msra.gmra.mrb[8].mxu0 %v6105_v60  ;;  %3961 = vmatmul.mubr.f32.vlgmr.msra.gmra.mrb[24].mxu1 %v6105_v60 }
 0x46d   :  { %4682 = vmatpush1.bf16.msra.mxu0 %v5701_v22  ;;  %4713 = vmatpush3.bf16.msra.mxu1 %v5766_v2 }
 0x46e   :  { %4684 = vmatprep.subr.bf16.mxu0 %v5704_v23  ;;  %4714 = vmatprep.subr.bf16.mxu1 %v5613_v0 }
 0x46f   :  { %1470 = vmatprep.mubr.f32.mxu0 %v5612_v1  ;;  %3995 = vmatprep.mubr.msk.f32.mxu1 %vm5614_vm1, %v5612_v1 }
 0x471   :  { %4686 = vmatpush1.bf16.msra.mxu0 %v5714_v29  ;;  %4716 = vmatpush3.bf16.msra.mxu1 %v5783_v12 }
 0x472   :  { %4688 = vmatprep.subr.bf16.mxu0 %v5717_v30  ;;  %4717 = vmatprep.subr.bf16.mxu1 %v5613_v0 }
 0x475   :  { %4690 = vmatpush1.bf16.msra.mxu0 %v5726_v36  ;;  %4719 = vmatpush3.bf16.msra.mxu1 %v5800_v21 }
 0x476   :  { %4692 = vmatprep.subr.bf16.mxu0 %v5735_v40  ;;  %4720 = vmatprep.subr.bf16.mxu1 %v5613_v0 }
 0x479   :  { %4694 = vmatpush1.bf16.msra.mxu0 %v5749_v49  ;;  %4722 = vmatpush3.bf16.msra.mxu1 %v5815_v28 }
 0x47a   :  { %4696 = vmatprep.subr.bf16.mxu0 %v5752_v50  ;;  %4723 = vmatprep.subr.bf16.mxu1 %v5613_v0 }
 0x47d   :  { %4698 = vmatpush1.bf16.msra.mxu0 %v5760_v58  ;;  %4725 = vmatpush3.bf16.msra.mxu1 %v5828_v34 }
 0x47e   :  { %4700 = vmatprep.subr.bf16.mxu0 %v5763_v59  ;;  %4726 = vmatprep.subr.bf16.mxu1 %v5613_v0 }
 0x481   :  { %4702 = vmatpush1.bf16.msra.mxu0 %v5774_v6  ;;  %4728 = vmatpush3.bf16.msra.mxu1 %v5842_v41 }
 0x482   :  { %4704 = vmatprep.subr.bf16.mxu0 %v5777_v7  ;;  %4729 = vmatprep.subr.bf16.mxu1 %v5613_v0 }
 0x485   :  { %4706 = vmatpush1.bf16.msra.mxu0 %v5792_v16  ;;  %4731 = vmatpush3.bf16.msra.mxu1 %v5856_v46 }
 0x486   :  { %4708 = vmatprep.subr.bf16.mxu0 %v5795_v18  ;;  %4732 = vmatprep.subr.bf16.mxu1 %v5613_v0 }
 0x489   :  { %4710 = vmatpush1.bf16.msra.mxu0 %v5809_v27  ;;  %4734 = vmatpush3.bf16.msra.mxu1 %v5870_v53 }
 0x48a   :  { %4736 = vmatprep.subr.bf16.mxu0 %v5699_v17  ;;  %4767 = vmatprep.subr.bf16.mxu1 %v5613_v0 }
 0x53f   :  { %v1303_v5 = vpop.f32.mrb[8].mxu0  ;;  %v1374_v61 = vpop.f32.mrb[24].mxu1 }
 0x540   :  { %v5336_v55 = vadd.f32 %v5964_v20, %v1303_v5  ;;  %v1305_v4 = vpop.f32.mrb[9].mxu0  ;;  %v3962_v8 = vpop.f32.mrb[25].mxu1  ;;  %v1375_v43 = vadd.f32 %v1374_v61, %v5970_v54 }
 0x541   :  { %v5338_v13 = vadd.f32 %v5966_v31, %v1305_v4 }
 0x542   :  { %v3421_v10 = vmul.f32 -1.442695, %v5336_v55 }
 0x543   :  { %v3422_v15 = vmul.f32 -1.442695, %v5338_v13 }
 0x544   :  { %5461 = vpow2.f32 %v3421_v10 }
 0x545   :  { %5463 = vpow2.f32 %v3422_v15 }
 0x54e   :  { %v5462_v25 = vpop.eup %5461 }
 0x54f   :  { %v1382_v33 = vadd.f32 1.0, %v5462_v25  ;;  %v5464_v37 = vpop.eup %5463 }
 0x550   :  { %v1389_v39 = vadd.f32 1.0, %v5464_v37 }
 0x551   :  { %5465 = vrcp.f32 %v1382_v33 }
 0x552   :  { %5467 = vrcp.f32 %v1389_v39 }
 0x55b   :  { %v5466_v57 = vpop.eup %5465 }
 0x55c   :  { %v1392_v3 = vmul.f32 %v5466_v57, %v1375_v43  ;;  %v5468_v62 = vpop.eup %5467 }
 0x55d   :  { %v1395_v9 = vsub.f32 1.0, %v5468_v62  ;;  %v1397_v55 = vmul.f32 %v5468_v62, %v6105_v60 }
 0x55e   :  { %v1393_v63 = vadd.f32 %v1392_v3, %v5939_v14 }
 0x560   :  { %5469 = vtanh.f32 %v1393_v63 }
 0x56a   :  { %v5470_v56 = vpop.eup %5469 }
 0x56b   :  { %v1396_v5 = vmul.f32 %v5470_v56, %v1395_v9 }
 0x56d   :  { %v6149_v4 = vadd.f32 %v1397_v55, %v1396_v5 }
 0x56f   :  { %1471 = vmatmul.mubr.f32.vlgmr.msra.gmra.mrb[10].mxu0 %v6149_v4  ;;  %3996 = vmatmul.mubr.f32.vlgmr.msra.gmra.mrb[26].mxu1 %v6149_v4 }
 0x570   :  { %4738 = vmatpush1.bf16.msra.mxu0 %v5701_v22  ;;  %4769 = vmatpush3.bf16.msra.mxu1 %v5766_v2 }
 0x571   :  { %4740 = vmatprep.subr.bf16.mxu0 %v5704_v23  ;;  %4770 = vmatprep.subr.bf16.mxu1 %v5613_v0 }
 0x572   :  { %1639 = vmatprep.mubr.f32.mxu0 %v5612_v1  ;;  %4030 = vmatprep.mubr.msk.f32.mxu1 %vm5614_vm1, %v5612_v1 }
 0x574   :  { %4742 = vmatpush1.bf16.msra.mxu0 %v5714_v29  ;;  %4772 = vmatpush3.bf16.msra.mxu1 %v5783_v12 }
 0x575   :  { %4744 = vmatprep.subr.bf16.mxu0 %v5717_v30  ;;  %4773 = vmatprep.subr.bf16.mxu1 %v5613_v0 }
 0x578   :  { %4746 = vmatpush1.bf16.msra.mxu0 %v5726_v36  ;;  %4775 = vmatpush3.bf16.msra.mxu1 %v5800_v21 }
 0x579   :  { %4748 = vmatprep.subr.bf16.mxu0 %v5735_v40  ;;  %4776 = vmatprep.subr.bf16.mxu1 %v5613_v0 }
 0x57c   :  { %4750 = vmatpush1.bf16.msra.mxu0 %v5749_v49  ;;  %4778 = vmatpush3.bf16.msra.mxu1 %v5815_v28 }
 0x57d   :  { %4752 = vmatprep.subr.bf16.mxu0 %v5752_v50  ;;  %4779 = vmatprep.subr.bf16.mxu1 %v5613_v0 }
 0x580   :  { %4754 = vmatpush1.bf16.msra.mxu0 %v5760_v58  ;;  %4781 = vmatpush3.bf16.msra.mxu1 %v5828_v34 }
 0x581   :  { %4756 = vmatprep.subr.bf16.mxu0 %v5763_v59  ;;  %4782 = vmatprep.subr.bf16.mxu1 %v5613_v0 }
 0x584   :  { %4758 = vmatpush1.bf16.msra.mxu0 %v5774_v6  ;;  %4784 = vmatpush3.bf16.msra.mxu1 %v5842_v41 }
 0x585   :  { %4760 = vmatprep.subr.bf16.mxu0 %v5777_v7  ;;  %4785 = vmatprep.subr.bf16.mxu1 %v5613_v0 }
 0x588   :  { %4762 = vmatpush1.bf16.msra.mxu0 %v5792_v16  ;;  %4787 = vmatpush3.bf16.msra.mxu1 %v5856_v46 }
 0x589   :  { %4764 = vmatprep.subr.bf16.mxu0 %v5795_v18  ;;  %4788 = vmatprep.subr.bf16.mxu1 %v5613_v0 }
 0x58c   :  { %4766 = vmatpush1.bf16.msra.mxu0 %v5809_v27  ;;  %4790 = vmatpush3.bf16.msra.mxu1 %v5870_v53 }
 0x58d   :  { %4792 = vmatprep.subr.bf16.mxu0 %v5699_v17  ;;  %4823 = vmatprep.subr.bf16.mxu1 %v5613_v0 }
 0x642   :  { %v1472_v14 = vpop.f32.mrb[10].mxu0  ;;  %v1543_v61 = vpop.f32.mrb[26].mxu1 }
 0x643   :  { %v5340_v8 = vadd.f32 %v5964_v20, %v1472_v14  ;;  %v1474_v10 = vpop.f32.mrb[11].mxu0  ;;  %v3997_v13 = vpop.f32.mrb[27].mxu1  ;;  %v1544_v3 = vadd.f32 %v1543_v61, %v5970_v54 }
 0x644   :  { %v5342_v25 = vadd.f32 %v5966_v31, %v1474_v10 }
 0x645   :  { %v3423_v15 = vmul.f32 -1.442695, %v5340_v8 }
 0x646   :  { %v3424_v33 = vmul.f32 -1.442695, %v5342_v25 }
 0x647   :  { %5471 = vpow2.f32 %v3423_v15 }
 0x648   :  { %5473 = vpow2.f32 %v3424_v33 }
 0x651   :  { %v5472_v37 = vpop.eup %5471 }
 0x652   :  { %v1551_v39 = vadd.f32 1.0, %v5472_v37  ;;  %v5474_v43 = vpop.eup %5473 }
 0x653   :  { %v1558_v57 = vadd.f32 1.0, %v5474_v43 }
 0x654   :  { %5475 = vrcp.f32 %v1551_v39 }
 0x655   :  { %5477 = vrcp.f32 %v1558_v57 }
 0x65e   :  { %v5476_v63 = vpop.eup %5475 }
 0x65f   :  { %v1561_v62 = vmul.f32 %v5476_v63, %v1544_v3  ;;  %v5478_v56 = vpop.eup %5477 }
 0x660   :  { %v1564_v5 = vsub.f32 1.0, %v5478_v56  ;;  %v1566_v8 = vmul.f32 %v5478_v56, %v6149_v4 }
 0x661   :  { %v1562_v9 = vadd.f32 %v1561_v62, %v5937_v11 }
 0x663   :  { %5479 = vtanh.f32 %v1562_v9 }
 0x66d   :  { %v5480_v55 = vpop.eup %5479 }
 0x66e   :  { %v1565_v14 = vmul.f32 %v5480_v55, %v1564_v5 }
 0x670   :  { %v6193_v10 = vadd.f32 %v1566_v8, %v1565_v14 }
 0x672   :  { %1640 = vmatmul.mubr.f32.vlgmr.msra.gmra.mrb[12].mxu0 %v6193_v10  ;;  %4031 = vmatmul.mubr.f32.vlgmr.msra.gmra.mrb[28].mxu1 %v6193_v10 }
 0x673   :  { %4794 = vmatpush1.bf16.msra.mxu0 %v5701_v22  ;;  %4825 = vmatpush3.bf16.msra.mxu1 %v5766_v2 }
 0x674   :  { %4796 = vmatprep.subr.bf16.mxu0 %v5704_v23  ;;  %4826 = vmatprep.subr.bf16.mxu1 %v5613_v0 }
 0x675   :  { %1808 = vmatprep.mubr.f32.mxu0 %v5612_v1  ;;  %4065 = vmatprep.mubr.msk.f32.mxu1 %vm5614_vm1, %v5612_v1 }
 0x677   :  { %4798 = vmatpush1.bf16.msra.mxu0 %v5714_v29  ;;  %4828 = vmatpush3.bf16.msra.mxu1 %v5783_v12 }
 0x678   :  { %4800 = vmatprep.subr.bf16.mxu0 %v5717_v30  ;;  %4829 = vmatprep.subr.bf16.mxu1 %v5613_v0 }
 0x67b   :  { %4802 = vmatpush1.bf16.msra.mxu0 %v5726_v36  ;;  %4831 = vmatpush3.bf16.msra.mxu1 %v5800_v21 }
 0x67c   :  { %4804 = vmatprep.subr.bf16.mxu0 %v5735_v40  ;;  %4832 = vmatprep.subr.bf16.mxu1 %v5613_v0 }
 0x67f   :  { %4806 = vmatpush1.bf16.msra.mxu0 %v5749_v49  ;;  %4834 = vmatpush3.bf16.msra.mxu1 %v5815_v28 }
 0x680   :  { %4808 = vmatprep.subr.bf16.mxu0 %v5752_v50  ;;  %4835 = vmatprep.subr.bf16.mxu1 %v5613_v0 }
 0x683   :  { %4810 = vmatpush1.bf16.msra.mxu0 %v5760_v58  ;;  %4837 = vmatpush3.bf16.msra.mxu1 %v5828_v34 }
 0x684   :  { %4812 = vmatprep.subr.bf16.mxu0 %v5763_v59  ;;  %4838 = vmatprep.subr.bf16.mxu1 %v5613_v0 }
 0x687   :  { %4814 = vmatpush1.bf16.msra.mxu0 %v5774_v6  ;;  %4840 = vmatpush3.bf16.msra.mxu1 %v5842_v41 }
 0x688   :  { %4816 = vmatprep.subr.bf16.mxu0 %v5777_v7  ;;  %4841 = vmatprep.subr.bf16.mxu1 %v5613_v0 }
 0x68b   :  { %4818 = vmatpush1.bf16.msra.mxu0 %v5792_v16  ;;  %4843 = vmatpush3.bf16.msra.mxu1 %v5856_v46 }
 0x68c   :  { %4820 = vmatprep.subr.bf16.mxu0 %v5795_v18  ;;  %4844 = vmatprep.subr.bf16.mxu1 %v5613_v0 }
 0x68f   :  { %4822 = vmatpush1.bf16.msra.mxu0 %v5809_v27  ;;  %4846 = vmatpush3.bf16.msra.mxu1 %v5870_v53 }
 0x690   :  { %4848 = vmatprep.subr.bf16.mxu0 %v5699_v17  ;;  %4879 = vmatprep.subr.bf16.mxu1 %v5613_v0 }
 0x745   :  { %v1641_v11 = vpop.f32.mrb[12].mxu0  ;;  %v1712_v61 = vpop.f32.mrb[28].mxu1 }
 0x746   :  { %v5344_v13 = vadd.f32 %v5964_v20, %v1641_v11  ;;  %v1643_v15 = vpop.f32.mrb[13].mxu0  ;;  %v4032_v25 = vpop.f32.mrb[29].mxu1  ;;  %v1713_v62 = vadd.f32 %v1712_v61, %v5970_v54 }
 0x747   :  { %v5346_v37 = vadd.f32 %v5966_v31, %v1643_v15 }
 0x748   :  { %v3425_v33 = vmul.f32 -1.442695, %v5344_v13 }
 0x749   :  { %v3426_v39 = vmul.f32 -1.442695, %v5346_v37 }
 0x74a   :  { %5481 = vpow2.f32 %v3425_v33 }
 0x74b   :  { %5483 = vpow2.f32 %v3426_v39 }
 0x754   :  { %v5482_v43 = vpop.eup %5481 }
 0x755   :  { %v1720_v57 = vadd.f32 1.0, %v5482_v43  ;;  %v5484_v3 = vpop.eup %5483 }
 0x756   :  { %v1727_v63 = vadd.f32 1.0, %v5484_v3 }
 0x757   :  { %5485 = vrcp.f32 %v1720_v57 }
 0x758   :  { %5487 = vrcp.f32 %v1727_v63 }
 0x761   :  { %v5486_v9 = vpop.eup %5485 }
 0x762   :  { %v1730_v56 = vmul.f32 %v5486_v9, %v1713_v62  ;;  %v5488_v55 = vpop.eup %5487 }
 0x763   :  { %v1733_v14 = vsub.f32 1.0, %v5488_v55  ;;  %v1735_v13 = vmul.f32 %v5488_v55, %v6193_v10 }
 0x764   :  { %v1731_v5 = vadd.f32 %v1730_v56, %v5943_v24 }
 0x766   :  { %5489 = vtanh.f32 %v1731_v5 }
 0x770   :  { %v5490_v8 = vpop.eup %5489 }
 0x771   :  { %v1734_v11 = vmul.f32 %v5490_v8, %v1733_v14 }
 0x773   :  { %v6237_v15 = vadd.f32 %v1735_v13, %v1734_v11 }
 0x775   :  { %1809 = vmatmul.mubr.f32.vlgmr.msra.gmra.mrb[14].mxu0 %v6237_v15  ;;  %4066 = vmatmul.mubr.f32.vlgmr.msra.gmra.mrb[30].mxu1 %v6237_v15 }
 0x776   :  { %4850 = vmatpush1.bf16.msra.mxu0 %v5701_v22  ;;  %4881 = vmatpush3.bf16.msra.mxu1 %v5766_v2 }
 0x777   :  { %4852 = vmatprep.subr.bf16.mxu0 %v5704_v23  ;;  %4882 = vmatprep.subr.bf16.mxu1 %v5613_v0 }
 0x778   :  { %1977 = vmatprep.mubr.f32.mxu0 %v5612_v1  ;;  %4100 = vmatprep.mubr.msk.f32.mxu1 %vm5614_vm1, %v5612_v1 }
 0x77a   :  { %4854 = vmatpush1.bf16.msra.mxu0 %v5714_v29  ;;  %4884 = vmatpush3.bf16.msra.mxu1 %v5783_v12 }
 0x77b   :  { %4856 = vmatprep.subr.bf16.mxu0 %v5717_v30  ;;  %4885 = vmatprep.subr.bf16.mxu1 %v5613_v0 }
 0x77e   :  { %4858 = vmatpush1.bf16.msra.mxu0 %v5726_v36  ;;  %4887 = vmatpush3.bf16.msra.mxu1 %v5800_v21 }
 0x77f   :  { %4860 = vmatprep.subr.bf16.mxu0 %v5735_v40  ;;  %4888 = vmatprep.subr.bf16.mxu1 %v5613_v0 }
 0x782   :  { %4862 = vmatpush1.bf16.msra.mxu0 %v5749_v49  ;;  %4890 = vmatpush3.bf16.msra.mxu1 %v5815_v28 }
 0x783   :  { %4864 = vmatprep.subr.bf16.mxu0 %v5752_v50  ;;  %4891 = vmatprep.subr.bf16.mxu1 %v5613_v0 }
 0x786   :  { %4866 = vmatpush1.bf16.msra.mxu0 %v5760_v58  ;;  %4893 = vmatpush3.bf16.msra.mxu1 %v5828_v34 }
 0x787   :  { %4868 = vmatprep.subr.bf16.mxu0 %v5763_v59  ;;  %4894 = vmatprep.subr.bf16.mxu1 %v5613_v0 }
 0x78a   :  { %4870 = vmatpush1.bf16.msra.mxu0 %v5774_v6  ;;  %4896 = vmatpush3.bf16.msra.mxu1 %v5842_v41 }
 0x78b   :  { %4872 = vmatprep.subr.bf16.mxu0 %v5777_v7  ;;  %4897 = vmatprep.subr.bf16.mxu1 %v5613_v0 }
 0x78e   :  { %4874 = vmatpush1.bf16.msra.mxu0 %v5792_v16  ;;  %4899 = vmatpush3.bf16.msra.mxu1 %v5856_v46 }
 0x78f   :  { %4876 = vmatprep.subr.bf16.mxu0 %v5795_v18  ;;  %4900 = vmatprep.subr.bf16.mxu1 %v5613_v0 }
 0x792   :  { %4878 = vmatpush1.bf16.msra.mxu0 %v5809_v27  ;;  %4902 = vmatpush3.bf16.msra.mxu1 %v5870_v53 }
 0x793   :  { %4904 = vmatprep.subr.bf16.mxu0 %v5699_v17  ;;  %4935 = vmatprep.subr.bf16.mxu1 %v5613_v0 }
 0x848   :  { %v1810_v24 = vpop.f32.mrb[14].mxu0  ;;  %v1881_v61 = vpop.f32.mrb[30].mxu1 }
 0x849   :  { %v5348_v25 = vadd.f32 %v5964_v20, %v1810_v24  ;;  %v1812_v33 = vpop.f32.mrb[15].mxu0  ;;  %v4067_v37 = vpop.f32.mrb[31].mxu1  ;;  %v1882_v56 = vadd.f32 %v1881_v61, %v5970_v54 }
 0x84a   :  { %v5350_v43 = vadd.f32 %v5966_v31, %v1812_v33 }
 0x84b   :  { %v3427_v39 = vmul.f32 -1.442695, %v5348_v25 }
 0x84c   :  { %v3428_v57 = vmul.f32 -1.442695, %v5350_v43 }
 0x84d   :  { %5491 = vpow2.f32 %v3427_v39 }
 0x84e   :  { %5493 = vpow2.f32 %v3428_v57 }
 0x857   :  { %v5492_v3 = vpop.eup %5491 }
 0x858   :  { %v1889_v63 = vadd.f32 1.0, %v5492_v3  ;;  %v5494_v62 = vpop.eup %5493 }
 0x859   :  { %v1896_v9 = vadd.f32 1.0, %v5494_v62 }
 0x85a   :  { %5495 = vrcp.f32 %v1889_v63 }
 0x85b   :  { %5497 = vrcp.f32 %v1896_v9 }
 0x864   :  { %v5496_v5 = vpop.eup %5495 }
 0x865   :  { %v1899_v55 = vmul.f32 %v5496_v5, %v1882_v56  ;;  %v5498_v8 = vpop.eup %5497 }
 0x866   :  { %v1902_v11 = vsub.f32 1.0, %v5498_v8  ;;  %v1904_v25 = vmul.f32 %v5498_v8, %v6237_v15 }
 0x867   :  { %v1900_v14 = vadd.f32 %v1899_v55, %v5941_v19 }
 0x869   :  { %5499 = vtanh.f32 %v1900_v14 }
 0x873   :  { %v5500_v13 = vpop.eup %5499 }
 0x874   :  { %v1903_v24 = vmul.f32 %v5500_v13, %v1902_v11 }
 0x876   :  { %v6281_v33 = vadd.f32 %v1904_v25, %v1903_v24 }
 0x878   :  { %1978 = vmatmul.mubr.f32.vlgmr.msra.gmra.mrb[16].mxu0 %v6281_v33  ;;  %4101 = vmatmul.mubr.f32.vlgmr.msra.gmra.mrb[32].mxu1 %v6281_v33 }
 0x879   :  { %4906 = vmatpush1.bf16.msra.mxu0 %v5701_v22  ;;  %4937 = vmatpush3.bf16.msra.mxu1 %v5766_v2 }
 0x87a   :  { %4908 = vmatprep.subr.bf16.mxu0 %v5704_v23  ;;  %4938 = vmatprep.subr.bf16.mxu1 %v5613_v0 }
 0x87b   :  { %2146 = vmatprep.mubr.f32.mxu0 %v5612_v1  ;;  %4135 = vmatprep.mubr.msk.f32.mxu1 %vm5614_vm1, %v5612_v1 }
 0x87d   :  { %4910 = vmatpush1.bf16.msra.mxu0 %v5714_v29  ;;  %4940 = vmatpush3.bf16.msra.mxu1 %v5783_v12 }
 0x87e   :  { %4912 = vmatprep.subr.bf16.mxu0 %v5717_v30  ;;  %4941 = vmatprep.subr.bf16.mxu1 %v5613_v0 }
 0x881   :  { %4914 = vmatpush1.bf16.msra.mxu0 %v5726_v36  ;;  %4943 = vmatpush3.bf16.msra.mxu1 %v5800_v21 }
 0x882   :  { %4916 = vmatprep.subr.bf16.mxu0 %v5735_v40  ;;  %4944 = vmatprep.subr.bf16.mxu1 %v5613_v0 }
 0x885   :  { %4918 = vmatpush1.bf16.msra.mxu0 %v5749_v49  ;;  %4946 = vmatpush3.bf16.msra.mxu1 %v5815_v28 }
 0x886   :  { %4920 = vmatprep.subr.bf16.mxu0 %v5752_v50  ;;  %4947 = vmatprep.subr.bf16.mxu1 %v5613_v0 }
 0x889   :  { %4922 = vmatpush1.bf16.msra.mxu0 %v5760_v58  ;;  %4949 = vmatpush3.bf16.msra.mxu1 %v5828_v34 }
 0x88a   :  { %4924 = vmatprep.subr.bf16.mxu0 %v5763_v59  ;;  %4950 = vmatprep.subr.bf16.mxu1 %v5613_v0 }
 0x88d   :  { %4926 = vmatpush1.bf16.msra.mxu0 %v5774_v6  ;;  %4952 = vmatpush3.bf16.msra.mxu1 %v5842_v41 }
 0x88e   :  { %4928 = vmatprep.subr.bf16.mxu0 %v5777_v7  ;;  %4953 = vmatprep.subr.bf16.mxu1 %v5613_v0 }
 0x891   :  { %4930 = vmatpush1.bf16.msra.mxu0 %v5792_v16  ;;  %4955 = vmatpush3.bf16.msra.mxu1 %v5856_v46 }
 0x892   :  { %4932 = vmatprep.subr.bf16.mxu0 %v5795_v18  ;;  %4956 = vmatprep.subr.bf16.mxu1 %v5613_v0 }
 0x895   :  { %4934 = vmatpush1.bf16.msra.mxu0 %v5809_v27  ;;  %4958 = vmatpush3.bf16.msra.mxu1 %v5870_v53 }
 0x896   :  { %4960 = vmatprep.subr.bf16.mxu0 %v5699_v17  ;;  %4991 = vmatprep.subr.bf16.mxu1 %v5613_v0 }
 0x94b   :  { %v1979_v19 = vpop.f32.mrb[16].mxu0  ;;  %v2050_v61 = vpop.f32.mrb[32].mxu1 }
 0x94c   :  { %v5352_v37 = vadd.f32 %v5964_v20, %v1979_v19  ;;  %v1981_v39 = vpop.f32.mrb[17].mxu0  ;;  %v4102_v43 = vpop.f32.mrb[33].mxu1  ;;  %v2051_v55 = vadd.f32 %v2050_v61, %v5970_v54 }
 0x94d   :  { %v5354_v3 = vadd.f32 %v5966_v31, %v1981_v39 }
 0x94e   :  { %v3429_v57 = vmul.f32 -1.442695, %v5352_v37 }
 0x94f   :  { %v3430_v63 = vmul.f32 -1.442695, %v5354_v3 }
 0x950   :  { %5501 = vpow2.f32 %v3429_v57 }
 0x951   :  { %5503 = vpow2.f32 %v3430_v63 }
 0x95a   :  { %v5502_v62 = vpop.eup %5501 }
 0x95b   :  { %v2058_v9 = vadd.f32 1.0, %v5502_v62  ;;  %v5504_v56 = vpop.eup %5503 }
 0x95c   :  { %v2065_v5 = vadd.f32 1.0, %v5504_v56 }
 0x95d   :  { %5505 = vrcp.f32 %v2058_v9 }
 0x95e   :  { %5507 = vrcp.f32 %v2065_v5 }
 0x967   :  { %v5506_v14 = vpop.eup %5505 }
 0x968   :  { %v2068_v8 = vmul.f32 %v5506_v14, %v2051_v55  ;;  %v5508_v13 = vpop.eup %5507 }
 0x969   :  { %v2071_v24 = vsub.f32 1.0, %v5508_v13  ;;  %v2073_v37 = vmul.f32 %v5508_v13, %v6281_v33 }
 0x96a   :  { %v2069_v11 = vadd.f32 %v2068_v8, %v5947_v32 }
 0x96c   :  { %5509 = vtanh.f32 %v2069_v11 }
 0x976   :  { %v5510_v25 = vpop.eup %5509 }
 0x977   :  { %v2072_v19 = vmul.f32 %v5510_v25, %v2071_v24 }
 0x979   :  { %v6325_v39 = vadd.f32 %v2073_v37, %v2072_v19 }
 0x97b   :  { %2147 = vmatmul.mubr.f32.vlgmr.msra.gmra.mrb[18].mxu0 %v6325_v39  ;;  %4136 = vmatmul.mubr.f32.vlgmr.msra.gmra.mrb[34].mxu1 %v6325_v39 }
 0x97c   :  { %4962 = vmatpush1.bf16.msra.mxu0 %v5701_v22  ;;  %4993 = vmatpush3.bf16.msra.mxu1 %v5766_v2 }
 0x97d   :  { %4964 = vmatprep.subr.bf16.mxu0 %v5704_v23  ;;  %4994 = vmatprep.subr.bf16.mxu1 %v5613_v0 }
 0x97e   :  { %2315 = vmatprep.mubr.f32.mxu0 %v5612_v1  ;;  %4170 = vmatprep.mubr.msk.f32.mxu1 %vm5614_vm1, %v5612_v1 }
 0x980   :  { %4966 = vmatpush1.bf16.msra.mxu0 %v5714_v29  ;;  %4996 = vmatpush3.bf16.msra.mxu1 %v5783_v12 }
 0x981   :  { %4968 = vmatprep.subr.bf16.mxu0 %v5717_v30  ;;  %4997 = vmatprep.subr.bf16.mxu1 %v5613_v0 }
 0x984   :  { %4970 = vmatpush1.bf16.msra.mxu0 %v5726_v36  ;;  %4999 = vmatpush3.bf16.msra.mxu1 %v5800_v21 }
 0x985   :  { %4972 = vmatprep.subr.bf16.mxu0 %v5735_v40  ;;  %5000 = vmatprep.subr.bf16.mxu1 %v5613_v0 }
 0x988   :  { %4974 = vmatpush1.bf16.msra.mxu0 %v5749_v49  ;;  %5002 = vmatpush3.bf16.msra.mxu1 %v5815_v28 }
 0x989   :  { %4976 = vmatprep.subr.bf16.mxu0 %v5752_v50  ;;  %5003 = vmatprep.subr.bf16.mxu1 %v5613_v0 }
 0x98c   :  { %4978 = vmatpush1.bf16.msra.mxu0 %v5760_v58  ;;  %5005 = vmatpush3.bf16.msra.mxu1 %v5828_v34 }
 0x98d   :  { %4980 = vmatprep.subr.bf16.mxu0 %v5763_v59  ;;  %5006 = vmatprep.subr.bf16.mxu1 %v5613_v0 }
 0x990   :  { %4982 = vmatpush1.bf16.msra.mxu0 %v5774_v6  ;;  %5008 = vmatpush3.bf16.msra.mxu1 %v5842_v41 }
 0x991   :  { %4984 = vmatprep.subr.bf16.mxu0 %v5777_v7  ;;  %5009 = vmatprep.subr.bf16.mxu1 %v5613_v0 }
 0x994   :  { %4986 = vmatpush1.bf16.msra.mxu0 %v5792_v16  ;;  %5011 = vmatpush3.bf16.msra.mxu1 %v5856_v46 }
 0x995   :  { %4988 = vmatprep.subr.bf16.mxu0 %v5795_v18  ;;  %5012 = vmatprep.subr.bf16.mxu1 %v5613_v0 }
 0x998   :  { %4990 = vmatpush1.bf16.msra.mxu0 %v5809_v27  ;;  %5014 = vmatpush3.bf16.msra.mxu1 %v5870_v53 }
 0x999   :  { %5016 = vmatprep.subr.bf16.mxu0 %v5699_v17  ;;  %5047 = vmatprep.subr.bf16.mxu1 %v5613_v0 }
 0xa4e   :  { %v2148_v32 = vpop.f32.mrb[18].mxu0  ;;  %v2219_v61 = vpop.f32.mrb[34].mxu1 }
 0xa4f   :  { %v5356_v43 = vadd.f32 %v5964_v20, %v2148_v32  ;;  %v2150_v57 = vpop.f32.mrb[19].mxu0  ;;  %v4137_v3 = vpop.f32.mrb[35].mxu1  ;;  %v2220_v8 = vadd.f32 %v2219_v61, %v5970_v54 }
 0xa50   :  { %v5358_v62 = vadd.f32 %v5966_v31, %v2150_v57 }
 0xa51   :  { %v3431_v63 = vmul.f32 -1.442695, %v5356_v43 }
 0xa52   :  { %v3432_v9 = vmul.f32 -1.442695, %v5358_v62 }
 0xa53   :  { %5511 = vpow2.f32 %v3431_v63 }
 0xa54   :  { %5513 = vpow2.f32 %v3432_v9 }
 0xa5d   :  { %v5512_v56 = vpop.eup %5511 }
 0xa5e   :  { %v2227_v5 = vadd.f32 1.0, %v5512_v56  ;;  %v5514_v55 = vpop.eup %5513 }
 0xa5f   :  { %v2234_v14 = vadd.f32 1.0, %v5514_v55 }
 0xa60   :  { %5515 = vrcp.f32 %v2227_v5 }
 0xa61   :  { %5517 = vrcp.f32 %v2234_v14 }
 0xa6a   :  { %v5516_v11 = vpop.eup %5515 }
 0xa6b   :  { %v2237_v13 = vmul.f32 %v5516_v11, %v2220_v8  ;;  %v5518_v25 = vpop.eup %5517 }
 0xa6c   :  { %v2240_v19 = vsub.f32 1.0, %v5518_v25  ;;  %v2242_v43 = vmul.f32 %v5518_v25, %v6325_v39 }
 0xa6d   :  { %v2238_v24 = vadd.f32 %v2237_v13, %v5945_v26 }
 0xa6f   :  { %5519 = vtanh.f32 %v2238_v24 }
 0xa79   :  { %v5520_v37 = vpop.eup %5519 }
 0xa7a   :  { %v2241_v32 = vmul.f32 %v5520_v37, %v2240_v19 }
 0xa7c   :  { %v6369_v57 = vadd.f32 %v2242_v43, %v2241_v32 }
 0xa7e   :  { %2316 = vmatmul.mubr.f32.vlgmr.msra.gmra.mrb[20].mxu0 %v6369_v57  ;;  %4171 = vmatmul.mubr.f32.vlgmr.msra.gmra.mrb[36].mxu1 %v6369_v57 }
 0xa7f   :  { %5018 = vmatpush1.bf16.msra.mxu0 %v5701_v22  ;;  %5049 = vmatpush3.bf16.msra.mxu1 %v5766_v2 }
 0xa80   :  { %5020 = vmatprep.subr.bf16.mxu0 %v5704_v23  ;;  %5050 = vmatprep.subr.bf16.mxu1 %v5613_v0 }
 0xa81   :  { %2484 = vmatprep.mubr.f32.mxu0 %v5612_v1  ;;  %4205 = vmatprep.mubr.msk.f32.mxu1 %vm5614_vm1, %v5612_v1 }
 0xa83   :  { %5022 = vmatpush1.bf16.msra.mxu0 %v5714_v29  ;;  %5052 = vmatpush3.bf16.msra.mxu1 %v5783_v12 }
 0xa84   :  { %5024 = vmatprep.subr.bf16.mxu0 %v5717_v30  ;;  %5053 = vmatprep.subr.bf16.mxu1 %v5613_v0 }
 0xa87   :  { %5026 = vmatpush1.bf16.msra.mxu0 %v5726_v36  ;;  %5055 = vmatpush3.bf16.msra.mxu1 %v5800_v21 }
 0xa88   :  { %5028 = vmatprep.subr.bf16.mxu0 %v5735_v40  ;;  %5056 = vmatprep.subr.bf16.mxu1 %v5613_v0 }
 0xa8b   :  { %5030 = vmatpush1.bf16.msra.mxu0 %v5749_v49  ;;  %5058 = vmatpush3.bf16.msra.mxu1 %v5815_v28 }
 0xa8c   :  { %5032 = vmatprep.subr.bf16.mxu0 %v5752_v50  ;;  %5059 = vmatprep.subr.bf16.mxu1 %v5613_v0 }
 0xa8f   :  { %5034 = vmatpush1.bf16.msra.mxu0 %v5760_v58  ;;  %5061 = vmatpush3.bf16.msra.mxu1 %v5828_v34 }
 0xa90   :  { %5036 = vmatprep.subr.bf16.mxu0 %v5763_v59  ;;  %5062 = vmatprep.subr.bf16.mxu1 %v5613_v0 }
 0xa93   :  { %5038 = vmatpush1.bf16.msra.mxu0 %v5774_v6  ;;  %5064 = vmatpush3.bf16.msra.mxu1 %v5842_v41 }
 0xa94   :  { %5040 = vmatprep.subr.bf16.mxu0 %v5777_v7  ;;  %5065 = vmatprep.subr.bf16.mxu1 %v5613_v0 }
 0xa97   :  { %5042 = vmatpush1.bf16.msra.mxu0 %v5792_v16  ;;  %5067 = vmatpush3.bf16.msra.mxu1 %v5856_v46 }
 0xa98   :  { %5044 = vmatprep.subr.bf16.mxu0 %v5795_v18  ;;  %5068 = vmatprep.subr.bf16.mxu1 %v5613_v0 }
 0xa9b   :  { %5046 = vmatpush1.bf16.msra.mxu0 %v5809_v27  ;;  %5070 = vmatpush3.bf16.msra.mxu1 %v5870_v53 }
 0xa9c   :  { %5072 = vmatprep.subr.bf16.mxu0 %v5699_v17  ;;  %5103 = vmatprep.subr.bf16.mxu1 %v5613_v0 }
 0xb51   :  { %v2317_v26 = vpop.f32.mrb[20].mxu0  ;;  %v2388_v61 = vpop.f32.mrb[36].mxu1 }
 0xb52   :  { %v5360_v3 = vadd.f32 %v5964_v20, %v2317_v26  ;;  %v2319_v63 = vpop.f32.mrb[21].mxu0  ;;  %v4172_v62 = vpop.f32.mrb[37].mxu1  ;;  %v2389_v13 = vadd.f32 %v2388_v61, %v5970_v54 }
 0xb53   :  { %v5362_v56 = vadd.f32 %v5966_v31, %v2319_v63 }
 0xb54   :  { %v3433_v9 = vmul.f32 -1.442695, %v5360_v3 }
 0xb55   :  { %v3434_v5 = vmul.f32 -1.442695, %v5362_v56 }
 0xb56   :  { %5521 = vpow2.f32 %v3433_v9 }
 0xb57   :  { %5523 = vpow2.f32 %v3434_v5 }
 0xb60   :  { %v5522_v55 = vpop.eup %5521 }
 0xb61   :  { %v2396_v14 = vadd.f32 1.0, %v5522_v55  ;;  %v5524_v8 = vpop.eup %5523 }
 0xb62   :  { %v2403_v11 = vadd.f32 1.0, %v5524_v8 }
 0xb63   :  { %5525 = vrcp.f32 %v2396_v14 }
 0xb64   :  { %5527 = vrcp.f32 %v2403_v11 }
 0xb6d   :  { %v5526_v24 = vpop.eup %5525 }
 0xb6e   :  { %v2406_v25 = vmul.f32 %v5526_v24, %v2389_v13  ;;  %v5528_v37 = vpop.eup %5527 }
 0xb6f   :  { %v2409_v32 = vsub.f32 1.0, %v5528_v37  ;;  %v2411_v3 = vmul.f32 %v5528_v37, %v6369_v57 }
 0xb70   :  { %v2407_v19 = vadd.f32 %v2406_v25, %v5951_v38 }
 0xb72   :  { %5529 = vtanh.f32 %v2407_v19 }
 0xb7c   :  { %v5530_v43 = vpop.eup %5529 }
 0xb7d   :  { %v2410_v26 = vmul.f32 %v5530_v43, %v2409_v32 }
 0xb7f   :  { %v6413_v63 = vadd.f32 %v2411_v3, %v2410_v26 }
 0xb81   :  { %2485 = vmatmul.mubr.f32.vlgmr.msra.gmra.mrb[22].mxu0 %v6413_v63  ;;  %4206 = vmatmul.mubr.f32.vlgmr.msra.gmra.mrb[38].mxu1 %v6413_v63 }
 0xb82   :  { %5074 = vmatpush1.bf16.msra.mxu0 %v5701_v22  ;;  %5105 = vmatpush3.bf16.msra.mxu1 %v5766_v2 }
 0xb83   :  { %5076 = vmatprep.subr.bf16.mxu0 %v5704_v23  ;;  %5106 = vmatprep.subr.bf16.mxu1 %v5613_v0 }
 0xb84   :  { %2653 = vmatprep.mubr.f32.mxu0 %v5612_v1  ;;  %4240 = vmatprep.mubr.msk.f32.mxu1 %vm5614_vm1, %v5612_v1 }
 0xb86   :  { %5078 = vmatpush1.bf16.msra.mxu0 %v5714_v29  ;;  %5108 = vmatpush3.bf16.msra.mxu1 %v5783_v12 }
 0xb87   :  { %5080 = vmatprep.subr.bf16.mxu0 %v5717_v30  ;;  %5109 = vmatprep.subr.bf16.mxu1 %v5613_v0 }
 0xb8a   :  { %5082 = vmatpush1.bf16.msra.mxu0 %v5726_v36  ;;  %5111 = vmatpush3.bf16.msra.mxu1 %v5800_v21 }
 0xb8b   :  { %5084 = vmatprep.subr.bf16.mxu0 %v5735_v40  ;;  %5112 = vmatprep.subr.bf16.mxu1 %v5613_v0 }
 0xb8e   :  { %5086 = vmatpush1.bf16.msra.mxu0 %v5749_v49  ;;  %5114 = vmatpush3.bf16.msra.mxu1 %v5815_v28 }
 0xb8f   :  { %5088 = vmatprep.subr.bf16.mxu0 %v5752_v50  ;;  %5115 = vmatprep.subr.bf16.mxu1 %v5613_v0 }
 0xb92   :  { %5090 = vmatpush1.bf16.msra.mxu0 %v5760_v58  ;;  %5117 = vmatpush3.bf16.msra.mxu1 %v5828_v34 }
 0xb93   :  { %5092 = vmatprep.subr.bf16.mxu0 %v5763_v59  ;;  %5118 = vmatprep.subr.bf16.mxu1 %v5613_v0 }
 0xb96   :  { %5094 = vmatpush1.bf16.msra.mxu0 %v5774_v6  ;;  %5120 = vmatpush3.bf16.msra.mxu1 %v5842_v41 }
 0xb97   :  { %5096 = vmatprep.subr.bf16.mxu0 %v5777_v7  ;;  %5121 = vmatprep.subr.bf16.mxu1 %v5613_v0 }
 0xb9a   :  { %5098 = vmatpush1.bf16.msra.mxu0 %v5792_v16  ;;  %5123 = vmatpush3.bf16.msra.mxu1 %v5856_v46 }
 0xb9b   :  { %5100 = vmatprep.subr.bf16.mxu0 %v5795_v18  ;;  %5124 = vmatprep.subr.bf16.mxu1 %v5613_v0 }
 0xb9e   :  { %5102 = vmatpush1.bf16.msra.mxu0 %v5809_v27  ;;  %5126 = vmatpush3.bf16.msra.mxu1 %v5870_v53 }
 0xb9f   :  { %5128 = vmatprep.subr.bf16.mxu0 %v5699_v17  ;;  %5159 = vmatprep.subr.bf16.mxu1 %v5613_v0 }
 0xc54   :  { %v2486_v38 = vpop.f32.mrb[22].mxu0  ;;  %v2557_v61 = vpop.f32.mrb[38].mxu1 }
 0xc55   :  { %v5364_v62 = vadd.f32 %v5964_v20, %v2486_v38  ;;  %v2488_v9 = vpop.f32.mrb[23].mxu0  ;;  %v4207_v56 = vpop.f32.mrb[39].mxu1  ;;  %v2558_v25 = vadd.f32 %v2557_v61, %v5970_v54 }
 0xc56   :  { %v5366_v55 = vadd.f32 %v5966_v31, %v2488_v9 }
 0xc57   :  { %v3435_v5 = vmul.f32 -1.442695, %v5364_v62 }
 0xc58   :  { %v3436_v14 = vmul.f32 -1.442695, %v5366_v55 }
 0xc59   :  { %5531 = vpow2.f32 %v3435_v5 }
 0xc5a   :  { %5533 = vpow2.f32 %v3436_v14 }
 0xc63   :  { %v5532_v8 = vpop.eup %5531 }
 0xc64   :  { %v2565_v11 = vadd.f32 1.0, %v5532_v8  ;;  %v5534_v13 = vpop.eup %5533 }
 0xc65   :  { %v2572_v24 = vadd.f32 1.0, %v5534_v13 }
 0xc66   :  { %5535 = vrcp.f32 %v2565_v11 }
 0xc67   :  { %5537 = vrcp.f32 %v2572_v24 }
 0xc70   :  { %v5536_v19 = vpop.eup %5535 }
 0xc71   :  { %v2575_v37 = vmul.f32 %v5536_v19, %v2558_v25  ;;  %v5538_v43 = vpop.eup %5537 }
 0xc72   :  { %v2578_v26 = vsub.f32 1.0, %v5538_v43  ;;  %v2580_v62 = vmul.f32 %v5538_v43, %v6413_v63 }
 0xc73   :  { %v2576_v32 = vadd.f32 %v2575_v37, %v5949_v35 }
 0xc75   :  { %5539 = vtanh.f32 %v2576_v32 }
 0xc7f   :  { %v5540_v3 = vpop.eup %5539 }
 0xc80   :  { %v2579_v38 = vmul.f32 %v5540_v3, %v2578_v26 }
 0xc82   :  { %v6457_v9 = vadd.f32 %v2580_v62, %v2579_v38 }
 0xc84   :  { %2654 = vmatmul.mubr.f32.vlgmr.msra.gmra.mrb[24].mxu0 %v6457_v9  ;;  %4241 = vmatmul.mubr.f32.vlgmr.msra.gmra.mrb[40].mxu1 %v6457_v9 }
 0xc85   :  { %5130 = vmatpush1.bf16.msra.mxu0 %v5701_v22  ;;  %5161 = vmatpush3.bf16.msra.mxu1 %v5766_v2 }
 0xc86   :  { %5132 = vmatprep.subr.bf16.mxu0 %v5704_v23  ;;  %5162 = vmatprep.subr.bf16.mxu1 %v5613_v0 }
 0xc87   :  { %2822 = vmatprep.mubr.f32.mxu0 %v5612_v1  ;;  %4275 = vmatprep.mubr.msk.f32.mxu1 %vm5614_vm1, %v5612_v1 }
 0xc89   :  { %5134 = vmatpush1.bf16.msra.mxu0 %v5714_v29  ;;  %5164 = vmatpush3.bf16.msra.mxu1 %v5783_v12 }
 0xc8a   :  { %5136 = vmatprep.subr.bf16.mxu0 %v5717_v30  ;;  %5165 = vmatprep.subr.bf16.mxu1 %v5613_v0 }
 0xc8d   :  { %5138 = vmatpush1.bf16.msra.mxu0 %v5726_v36  ;;  %5167 = vmatpush3.bf16.msra.mxu1 %v5800_v21 }
 0xc8e   :  { %5140 = vmatprep.subr.bf16.mxu0 %v5735_v40  ;;  %5168 = vmatprep.subr.bf16.mxu1 %v5613_v0 }
 0xc91   :  { %5142 = vmatpush1.bf16.msra.mxu0 %v5749_v49  ;;  %5170 = vmatpush3.bf16.msra.mxu1 %v5815_v28 }
 0xc92   :  { %5144 = vmatprep.subr.bf16.mxu0 %v5752_v50  ;;  %5171 = vmatprep.subr.bf16.mxu1 %v5613_v0 }
 0xc95   :  { %5146 = vmatpush1.bf16.msra.mxu0 %v5760_v58  ;;  %5173 = vmatpush3.bf16.msra.mxu1 %v5828_v34 }
 0xc96   :  { %5148 = vmatprep.subr.bf16.mxu0 %v5763_v59  ;;  %5174 = vmatprep.subr.bf16.mxu1 %v5613_v0 }
 0xc99   :  { %5150 = vmatpush1.bf16.msra.mxu0 %v5774_v6  ;;  %5176 = vmatpush3.bf16.msra.mxu1 %v5842_v41 }
 0xc9a   :  { %5152 = vmatprep.subr.bf16.mxu0 %v5777_v7  ;;  %5177 = vmatprep.subr.bf16.mxu1 %v5613_v0 }
 0xc9d   :  { %5154 = vmatpush1.bf16.msra.mxu0 %v5792_v16  ;;  %5179 = vmatpush3.bf16.msra.mxu1 %v5856_v46 }
 0xc9e   :  { %5156 = vmatprep.subr.bf16.mxu0 %v5795_v18  ;;  %5180 = vmatprep.subr.bf16.mxu1 %v5613_v0 }
 0xca1   :  { %5158 = vmatpush1.bf16.msra.mxu0 %v5809_v27  ;;  %5182 = vmatpush3.bf16.msra.mxu1 %v5870_v53 }
 0xca2   :  { %5184 = vmatprep.subr.bf16.mxu0 %v5699_v17  ;;  %5215 = vmatprep.subr.bf16.mxu1 %v5613_v0 }
 0xd57   :  { %v2655_v35 = vpop.f32.mrb[24].mxu0  ;;  %v2726_v61 = vpop.f32.mrb[40].mxu1 }
 0xd58   :  { %v5368_v56 = vadd.f32 %v5964_v20, %v2655_v35  ;;  %v2657_v5 = vpop.f32.mrb[25].mxu0  ;;  %v4242_v55 = vpop.f32.mrb[41].mxu1  ;;  %v2727_v37 = vadd.f32 %v2726_v61, %v5970_v54 }
 0xd59   :  { %v5370_v8 = vadd.f32 %v5966_v31, %v2657_v5 }
 0xd5a   :  { %v3437_v14 = vmul.f32 -1.442695, %v5368_v56 }
 0xd5b   :  { %v3438_v11 = vmul.f32 -1.442695, %v5370_v8 }
 0xd5c   :  { %5541 = vpow2.f32 %v3437_v14 }
 0xd5d   :  { %5543 = vpow2.f32 %v3438_v11 }
 0xd66   :  { %v5542_v13 = vpop.eup %5541 }
 0xd67   :  { %v2734_v24 = vadd.f32 1.0, %v5542_v13  ;;  %v5544_v25 = vpop.eup %5543 }
 0xd68   :  { %v2741_v19 = vadd.f32 1.0, %v5544_v25 }
 0xd69   :  { %5545 = vrcp.f32 %v2734_v24 }
 0xd6a   :  { %5547 = vrcp.f32 %v2741_v19 }
 0xd73   :  { %v5546_v32 = vpop.eup %5545 }
 0xd74   :  { %v2744_v43 = vmul.f32 %v5546_v32, %v2727_v37  ;;  %v5548_v3 = vpop.eup %5547 }
 0xd75   :  { %v2747_v38 = vsub.f32 1.0, %v5548_v3  ;;  %v2749_v56 = vmul.f32 %v5548_v3, %v6457_v9 }
 0xd76   :  { %v2745_v26 = vadd.f32 %v2744_v43, %v5955_v44 }
 0xd78   :  { %5549 = vtanh.f32 %v2745_v26 }
 0xd82   :  { %v5550_v62 = vpop.eup %5549 }
 0xd83   :  { %v2748_v35 = vmul.f32 %v5550_v62, %v2747_v38 }
 0xd85   :  { %v6501_v5 = vadd.f32 %v2749_v56, %v2748_v35 }
 0xd87   :  { %2823 = vmatmul.mubr.f32.vlgmr.msra.gmra.mrb[26].mxu0 %v6501_v5  ;;  %4276 = vmatmul.mubr.f32.vlgmr.msra.gmra.mrb[42].mxu1 %v6501_v5 }
 0xd88   :  { %5186 = vmatpush1.bf16.msra.mxu0 %v5701_v22  ;;  %5217 = vmatpush3.bf16.msra.mxu1 %v5766_v2 }
 0xd89   :  { %5188 = vmatprep.subr.bf16.mxu0 %v5704_v23  ;;  %5218 = vmatprep.subr.bf16.mxu1 %v5613_v0 }
 0xd8a   :  { %2991 = vmatprep.mubr.f32.mxu0 %v5612_v1  ;;  %4310 = vmatprep.mubr.msk.f32.mxu1 %vm5614_vm1, %v5612_v1 }
 0xd8c   :  { %5190 = vmatpush1.bf16.msra.mxu0 %v5714_v29  ;;  %5220 = vmatpush3.bf16.msra.mxu1 %v5783_v12 }
 0xd8d   :  { %5192 = vmatprep.subr.bf16.mxu0 %v5717_v30  ;;  %5221 = vmatprep.subr.bf16.mxu1 %v5613_v0 }
 0xd90   :  { %5194 = vmatpush1.bf16.msra.mxu0 %v5726_v36  ;;  %5223 = vmatpush3.bf16.msra.mxu1 %v5800_v21 }
 0xd91   :  { %5196 = vmatprep.subr.bf16.mxu0 %v5735_v40  ;;  %5224 = vmatprep.subr.bf16.mxu1 %v5613_v0 }
 0xd94   :  { %5198 = vmatpush1.bf16.msra.mxu0 %v5749_v49  ;;  %5226 = vmatpush3.bf16.msra.mxu1 %v5815_v28 }
 0xd95   :  { %5200 = vmatprep.subr.bf16.mxu0 %v5752_v50  ;;  %5227 = vmatprep.subr.bf16.mxu1 %v5613_v0 }
 0xd98   :  { %5202 = vmatpush1.bf16.msra.mxu0 %v5760_v58  ;;  %5229 = vmatpush3.bf16.msra.mxu1 %v5828_v34 }
 0xd99   :  { %5204 = vmatprep.subr.bf16.mxu0 %v5763_v59  ;;  %5230 = vmatprep.subr.bf16.mxu1 %v5613_v0 }
 0xd9c   :  { %5206 = vmatpush1.bf16.msra.mxu0 %v5774_v6  ;;  %5232 = vmatpush3.bf16.msra.mxu1 %v5842_v41 }
 0xd9d   :  { %5208 = vmatprep.subr.bf16.mxu0 %v5777_v7  ;;  %5233 = vmatprep.subr.bf16.mxu1 %v5613_v0 }
 0xda0   :  { %5210 = vmatpush1.bf16.msra.mxu0 %v5792_v16  ;;  %5235 = vmatpush3.bf16.msra.mxu1 %v5856_v46 }
 0xda1   :  { %5212 = vmatprep.subr.bf16.mxu0 %v5795_v18  ;;  %5236 = vmatprep.subr.bf16.mxu1 %v5613_v0 }
 0xda4   :  { %5214 = vmatpush1.bf16.msra.mxu0 %v5809_v27  ;;  %5238 = vmatpush3.bf16.msra.mxu1 %v5870_v53 }
 0xda5   :  { %5240 = vmatprep.subr.bf16.mxu0 %v5699_v17  ;;  %5271 = vmatprep.subr.bf16.mxu1 %v5613_v0 }
 0xe5a   :  { %v2824_v44 = vpop.f32.mrb[26].mxu0  ;;  %v2895_v61 = vpop.f32.mrb[42].mxu1 }
 0xe5b   :  { %v5372_v55 = vadd.f32 %v5964_v20, %v2824_v44  ;;  %v2826_v14 = vpop.f32.mrb[27].mxu0  ;;  %v4277_v8 = vpop.f32.mrb[43].mxu1  ;;  %v2896_v17 = vadd.f32 %v2895_v61, %v5970_v54  ;;  %v3262_v61 = vld [vmem:[%s6677_s5 + $0x10] sm:$0xff] }
 0xe5c   :  { %v5374_v13 = vadd.f32 %v5966_v31, %v2826_v14  ;;  %v3264_v8 = vld [vmem:[%s6677_s5 + $0x20] sm:$0xff] }
 0xe5d   :  { %v3439_v11 = vmul.f32 -1.442695, %v5372_v55 }
 0xe5e   :  { %v3440_v24 = vmul.f32 -1.442695, %v5374_v13 }
 0xe5f   :  { %5551 = vpow2.f32 %v3439_v11  ;;  %v3265_v11 = vld [vmem:[%s6677_s5 + $0x28] sm:$0xff] }
 0xe60   :  { %5553 = vpow2.f32 %v3440_v24  ;;  %v5302_v13 = vpack.c.bf16 %v3265_v11, %v3264_v8  ;;  %v3266_v24 = vld [vmem:[%s6677_s5 + $0x30] sm:$0xff] }
 0xe69   :  { %v5552_v25 = vpop.eup %5551 }
 0xe6a   :  { %v2903_v19 = vadd.f32 1.0, %v5552_v25  ;;  %v5554_v37 = vpop.eup %5553  ;;  %v3267_v25 = vld [vmem:[%s6677_s5 + $0x38] sm:$0xff] }
 0xe6b   :  { %v2910_v32 = vadd.f32 1.0, %v5554_v37  ;;  %v3268_v37 = vld [vmem:[%s6677_s5 + $0x40] sm:$0xff] }
 0xe6c   :  { %5555 = vrcp.f32 %v2903_v19  ;;  %v5305_v19 = vpack.c.bf16 %v3267_v25, %v3266_v24 }
 0xe6d   :  { %5557 = vrcp.f32 %v2910_v32  ;;  %v3269_v32 = vld [vmem:[%s6677_s5 + $0x48] sm:$0xff] }
 0xe76   :  { %v5556_v43 = vpop.eup %5555 }
 0xe77   :  { %v2913_v26 = vmul.f32 %v5556_v43, %v2896_v17  ;;  %v5558_v38 = vpop.eup %5557  ;;  %v5308_v17 = vpack.c.bf16 %v3269_v32, %v3268_v37  ;;  %v3270_v43 = vld [vmem:[%s6677_s5 + $0x50] sm:$0xff] }
 0xe78   :  { %v2916_v62 = vsub.f32 1.0, %v5558_v38  ;;  %v2918_v44 = vmul.f32 %v5558_v38, %v6501_v5  ;;  %v3272_v38 = vld [vmem:[%s6677_s5 + $0x60] sm:$0xff] }
 0xe79   :  { %v2914_v3 = vadd.f32 %v2913_v26, %v5953_v42  ;;  %v3261_v42 = vld [vmem:[%s6677_s5 + $0x8] sm:$0xff]  ;;  %v3271_v26 = vld [vmem:[%s6677_s5 + $0x58] sm:$0xff] }
 0xe7b   :  { %5559 = vtanh.f32 %v2914_v3  ;;  %v5311_v3 = vpack.c.bf16 %v3271_v26, %v3270_v43 }
 0xe85   :  { %v5560_v35 = vpop.eup %5559 }
 0xe86   :  { %v2917_v56 = vmul.f32 %v5560_v35, %v2916_v62  ;;  %v3273_v62 = vld [vmem:[%s6677_s5 + $0x68] sm:$0xff] }
 0xe87   :  { %v5314_v35 = vpack.c.bf16 %v3273_v62, %v3272_v38 }
 0xe88   :  { %v6545_v55 = vadd.f32 %v2918_v44, %v2917_v56  ;;  %v3274_v56 = vld [vmem:[%s6677_s5 + $0x70] sm:$0xff]  ;;  %v3275_v44 = vld [vmem:[%s6677_s5 + $0x78] sm:$0xff] }
 0xe8a   :  { %2992 = vmatmul.mubr.f32.vlgmr.msra.gmra.mrb[28].mxu0 %v6545_v55  ;;  %4311 = vmatmul.mubr.f32.vlgmr.msra.gmra.mrb[44].mxu1 %v6545_v55 }
 0xe8b   :  { %5242 = vmatpush1.bf16.msra.mxu0 %v5701_v22  ;;  %5273 = vmatpush3.bf16.msra.mxu1 %v5766_v2 }
 0xe8c   :  { %5244 = vmatprep.subr.bf16.mxu0 %v5704_v23  ;;  %5274 = vmatprep.subr.bf16.mxu1 %v5613_v0 }
 0xe8d   :  { %3160 = vmatprep.mubr.f32.mxu0 %v5612_v1  ;;  %4345 = vmatprep.mubr.msk.f32.mxu1 %vm5614_vm1, %v5612_v1 }
 0xe8f   :  { %5246 = vmatpush1.bf16.msra.mxu0 %v5714_v29  ;;  %5276 = vmatpush3.bf16.msra.mxu1 %v5783_v12 }
 0xe90   :  { %5248 = vmatprep.subr.bf16.mxu0 %v5717_v30  ;;  %5277 = vmatprep.subr.bf16.mxu1 %v5613_v0 }
 0xe93   :  { %5250 = vmatpush1.bf16.msra.mxu0 %v5726_v36  ;;  %5279 = vmatpush3.bf16.msra.mxu1 %v5800_v21 }
 0xe94   :  { %5252 = vmatprep.subr.bf16.mxu0 %v5735_v40  ;;  %5280 = vmatprep.subr.bf16.mxu1 %v5613_v0 }
 0xe97   :  { %5254 = vmatpush1.bf16.msra.mxu0 %v5749_v49  ;;  %5282 = vmatpush3.bf16.msra.mxu1 %v5815_v28 }
 0xe98   :  { %5256 = vmatprep.subr.bf16.mxu0 %v5752_v50  ;;  %5283 = vmatprep.subr.bf16.mxu1 %v5613_v0 }
 0xe9b   :  { %5258 = vmatpush1.bf16.msra.mxu0 %v5760_v58  ;;  %5285 = vmatpush3.bf16.msra.mxu1 %v5828_v34 }
 0xe9c   :  { %5260 = vmatprep.subr.bf16.mxu0 %v5763_v59  ;;  %5286 = vmatprep.subr.bf16.mxu1 %v5613_v0 }
 0xe9f   :  { %5262 = vmatpush1.bf16.msra.mxu0 %v5774_v6  ;;  %5288 = vmatpush3.bf16.msra.mxu1 %v5842_v41 }
 0xea0   :  { %5264 = vmatprep.subr.bf16.mxu0 %v5777_v7  ;;  %5289 = vmatprep.subr.bf16.mxu1 %v5613_v0 }
 0xea3   :  { %5266 = vmatpush1.bf16.msra.mxu0 %v5792_v16  ;;  %5291 = vmatpush3.bf16.msra.mxu1 %v5856_v46 }
 0xea4   :  { %5268 = vmatprep.subr.bf16.mxu0 %v5795_v18  ;;  %5292 = vmatprep.subr.bf16.mxu1 %v5613_v0 }
 0xea7   :  { %5270 = vmatpush1.bf16.msra.mxu0 %v5809_v27  ;;  %5294 = vmatpush3.bf16.msra.mxu1 %v5870_v53  ;;  %v3260_v53 = vld [vmem:[%s6677_s5] sm:$0xff] }
 0xea8   :  { %5295 = vmatprep.subr.bf16.mxu1 %v5613_v0 }
 0xf5d   :  { %v2993_v22 = vpop.f32.mrb[28].mxu0  ;;  %v3064_v23 = vpop.f32.mrb[44].mxu1 }
 0xf5e   :  { %v5376_v29 = vadd.f32 %v5964_v20, %v2993_v22  ;;  %v2995_v30 = vpop.f32.mrb[29].mxu0  ;;  %v4312_v36 = vpop.f32.mrb[45].mxu1  ;;  %v3065_v7 = vadd.f32 %v3064_v23, %v5970_v54  ;;  %v5317_v22 = vpack.c.bf16 %v3275_v44, %v3274_v56 }
 0xf5f   :  { %v5378_v49 = vadd.f32 %v5966_v31, %v2995_v30 }
 0xf60   :  { %v3441_v40 = vmul.f32 -1.442695, %v5376_v29 }
 0xf61   :  { %v3442_v50 = vmul.f32 -1.442695, %v5378_v49 }
 0xf62   :  { %5561 = vpow2.f32 %v3441_v40 }
 0xf63   :  { %5563 = vpow2.f32 %v3442_v50 }
 0xf6c   :  { %v5562_v58 = vpop.eup %5561 }
 0xf6d   :  { %v3072_v59 = vadd.f32 1.0, %v5562_v58  ;;  %v5564_v2 = vpop.eup %5563 }
 0xf6e   :  { %v3079_v6 = vadd.f32 1.0, %v5564_v2 }
 0xf6f   :  { %5565 = vrcp.f32 %v3072_v59 }
 0xf70   :  { %5567 = vrcp.f32 %v3079_v6  ;;  %v892_v6 = vadd.f32 %v6017_v52, %v5973_v45 }
 0xf79   :  { %v5566_v12 = vpop.eup %5565 }
 0xf7a   :  { %v3082_v16 = vmul.f32 %v5566_v12, %v3065_v7  ;;  %v5568_v21 = vpop.eup %5567  ;;  %v1061_v7 = vadd.f32 %v6061_v48, %v892_v6 }
 0xf7b   :  { %v3085_v27 = vsub.f32 1.0, %v5568_v21  ;;  %v3087_v41 = vmul.f32 %v5568_v21, %v6545_v55 }
 0xf7c   :  { %v3083_v18 = vadd.f32 %v3082_v16, %v5959_v51  ;;  %v5296_v51 = vpack.c.bf16 %v3261_v42, %v3260_v53  ;;  %v1230_v12 = vadd.f32 %v6105_v60, %v1061_v7 }
 0xf7e   :  { %5569 = vtanh.f32 %v3083_v18  ;;  %v1399_v16 = vadd.f32 %v6149_v4, %v1230_v12 }
 0xf80   :  { %v1568_v21 = vadd.f32 %v6193_v10, %v1399_v16 }
 0xf88   :  { %v5570_v28 = vpop.eup %5569 }
 0xf89   :  { %v3086_v34 = vmul.f32 %v5570_v28, %v3085_v27  ;;  %v1737_v28 = vadd.f32 %v6237_v15, %v1568_v21 }
 0xf8b   :  { %v6588_v46 = vadd.f32 %v3087_v41, %v3086_v34  ;;  %v1906_v45 = vadd.f32 %v6281_v33, %v1737_v28 }
 0xf8d   :  { %3161 = vmatmul.mubr.f32.vlgmr.msra.gmra.mrb[30].mxu0 %v6588_v46  ;;  %4346 = vmatmul.mubr.f32.vlgmr.msra.gmra.mrb[46].mxu1 %v6588_v46  ;;  %v2075_v52 = vadd.f32 %v6325_v39, %v1906_v45 }
 0xf8e   :  { %4380 = vmatprep.mubr.msk.f32.mxu1 %vm5614_vm1, %v5612_v1  ;;  %5297 = vmatpush3.bf16.msra.mxu1 %v5296_v51  ;;  %v3263_v1 = vld [vmem:[%s6677_s5 + $0x18] sm:$0xff] }
 0xf8f   :  { %5298 = vmatprep.subr.bf16.mxu1 %v5613_v0  ;;  %v5299_v14 = vpack.c.bf16 %v3263_v1, %v3262_v61  ;;  %v2244_v48 = vadd.f32 %v6369_v57, %v2075_v52  ;;  %v3445_v57 = vld [vmem:[#allocation3] ss:$0 sm:$0xff] }
 0xf91   :  { %v2413_v60 = vadd.f32 %v6413_v63, %v2244_v48 }
 0xf92   :  { %5300 = vmatpush3.bf16.msra.mxu1 %v5299_v14 }
 0xf93   :  { %5301 = vmatprep.subr.bf16.mxu1 %v5613_v0 }
 0xf96   :  { %5303 = vmatpush3.bf16.msra.mxu1 %v5302_v13 }
 0xf97   :  { %5304 = vmatprep.subr.bf16.mxu1 %v5613_v0 }
 0xf9a   :  { %5306 = vmatpush3.bf16.msra.mxu1 %v5305_v19 }
 0xf9b   :  { %5307 = vmatprep.subr.bf16.mxu1 %v5613_v0 }
 0xf9e   :  { %5309 = vmatpush3.bf16.msra.mxu1 %v5308_v17 }
 0xf9f   :  { %5310 = vmatprep.subr.bf16.mxu1 %v5613_v0 }
 0xfa2   :  { %5312 = vmatpush3.bf16.msra.mxu1 %v5311_v3 }
 0xfa3   :  { %5313 = vmatprep.subr.bf16.mxu1 %v5613_v0 }
 0xfa6   :  { %5315 = vmatpush3.bf16.msra.mxu1 %v5314_v35 }
 0xfa7   :  { %5316 = vmatprep.subr.bf16.mxu1 %v5613_v0 }
 0xfaa   :  { %5318 = vmatpush3.bf16.msra.mxu1 %v5317_v22 }
0x1060   :  { %v3162_v23 = vpop.f32.mrb[30].mxu0  ;;  %v3233_v29 = vpop.f32.mrb[46].mxu1 }
0x1061   :  { %v5380_v30 = vadd.f32 %v5964_v20, %v3162_v23  ;;  %v3164_v36 = vpop.f32.mrb[31].mxu0  ;;  %v4347_v40 = vpop.f32.mrb[47].mxu1  ;;  %v3234_v18 = vadd.f32 %v3233_v29, %v5970_v54  ;;  %v2582_v54 = vadd.f32 %v6457_v9, %v2413_v60 }
0x1062   :  { %v5382_v50 = vadd.f32 %v5966_v31, %v3164_v36 }
0x1063   :  { %v3443_v49 = vmul.f32 -1.442695, %v5380_v30  ;;  %v2751_v10 = vadd.f32 %v6501_v5, %v2582_v54 }
0x1064   :  { %v3444_v58 = vmul.f32 -1.442695, %v5382_v50 }
0x1065   :  { %5571 = vpow2.f32 %v3443_v49  ;;  %v2920_v15 = vadd.f32 %v6545_v55, %v2751_v10 }
0x1066   :  { %5573 = vpow2.f32 %v3444_v58 }
0x1067   :  { %v3089_v33 = vadd.f32 %v6588_v46, %v2920_v15 }
0x106f   :  { %v5572_v59 = vpop.eup %5571 }
0x1070   :  { %v3241_v2 = vadd.f32 1.0, %v5572_v59  ;;  %v5574_v0 = vpop.eup %5573 }
0x1071   :  { %v3248_v20 = vadd.f32 1.0, %v5574_v0 }
0x1072   :  { %5575 = vrcp.f32 %v3241_v2 }
0x1073   :  { %5577 = vrcp.f32 %v3248_v20 }
0x107c   :  { %v5576_v31 = vpop.eup %5575 }
0x107d   :  { %v3251_v27 = vmul.f32 %v5576_v31, %v3234_v18  ;;  %v5578_v4 = vpop.eup %5577 }
0x107e   :  { %v3254_v41 = vsub.f32 1.0, %v5578_v4 }
0x107f   :  { %v3252_v34 = vadd.f32 %v3251_v27, %v5957_v47  ;;  %v3256_v47 = vmul.f32 %v5578_v4, %v6588_v46 }
0x1081   :  { %5579 = vtanh.f32 %v3252_v34 }
0x108b   :  { %v5580_v53 = vpop.eup %5579 }
0x108c   :  { %v3255_v42 = vmul.f32 %v5580_v53, %v3254_v41 }
0x108e   :  { %v3257_v51 = vadd.f32 %v3256_v47, %v3255_v42 }
0x1090   :  { %v3258_v39 = vadd.f32 %v3257_v51, %v3089_v33 }
0x1092   :  { %v3259_v61 = vmul.f32 0.0625, %v3258_v39 }
0x1094   :  { %4381 = vmatmul.mubr.f32.vlgmr.msra.gmra.mrb[48].mxu1 %v3259_v61 }
0x1167   :  { %v3349_v63 = vpop.f32.mrb[48].mxu1 }
0x1168   :  { %v3350_v1 = vadd.f32 %v3445_v57, %v3349_v63  ;;  %v4382_v14 = vpop.f32.mrb[49].mxu1 }
0x116a   :  { %v3446_v9 = vmul.f32 -1.442695, %v3350_v1 }
0x116c   :  { %5581 = vpow2.f32 %v3446_v9 }
0x1176   :  { %v5582_v5 = vpop.eup %5581 }
0x1177   :  { %v3356_v8 = vadd.f32 1.0, %v5582_v5 }
0x1179   :  { %5583 = vrcp.f32 %v3356_v8 }
0x1183   :  { %v5584_v55 = vpop.eup %5583 }
0x1184   :  { %3360 = vst.msk [vmem:[%s6679_s7] sm:$0xff] %vm3359_vm2, %v5584_v55 }
0x1185   :  { %3365 = vsyncpa [#allocation5], 1 }

</bundles_post_ra>
